<compile_context>
chip_gen: v7x
topology: tpu7x:2x2x1
jax: 0.10.0
libtpu: 0.0.40
codegen_flags: <defaults>
</compile_context>

<pallas_src>
import functools
import math

import numpy as np
import jax
import jax.numpy as jnp
from jax.experimental import pallas as pl
from jax.experimental.pallas import tpu as pltpu


# ---------------------------------------------------------------------------
# numpy mirror of get_mask / get_concat_mask (used only by the JAX reference)
# ---------------------------------------------------------------------------
def _get_mask_np(seq_len, encoding):
    m = (np.triu(np.ones((seq_len, seq_len)), k=1)
         + np.tril(np.ones((seq_len, seq_len)), k=-(1 + int(encoding) * 5)))
    return m.astype(bool)


def _get_concat_mask_np(seq_len, q_seq, kv_seq, encoding):
    reps = int(kv_seq // q_seq)
    return np.concatenate([_get_mask_np(seq_len, encoding) for _ in range(reps)],
                          axis=1)


# ---------------------------------------------------------------------------
# fused kernel: one program per (batch, query-tile)
# ---------------------------------------------------------------------------
def _fused_attn_kernel(*refs, heads, head_dim, seq_len, tq, band, cross):
    if cross:
        (x_ref, e_ref, wq_ref, wkv_ref, wo_ref,
         bq_ref, bkv_ref, bo_ref, o_ref) = refs
    else:
        (x_ref, wq_ref, wkv_ref, wo_ref,
         bq_ref, bkv_ref, bo_ref, o_ref) = refs
        e_ref = x_ref

    H, hd = heads, head_dim
    D = H * hd
    in_dt = x_ref.dtype

    q_off = pl.multiple_of(pl.program_id(1) * tq, tq)
    if cross:
        x_tile = x_ref[0]                               # (tq, D) tile block
    else:
        x_tile = x_ref[0, pl.ds(q_off, tq), :]          # slice tile from resident x
    enc = e_ref[0]                                      # (Se, D)
    Se = enc.shape[0]

    # --- fused projections: operands stay in the input dtype, f32 accumulate.
    #     1/sqrt(hd) is already folded into wq_ref / bq_ref by the wrapper.
    q2 = jnp.dot(x_tile, wq_ref[...],
                 preferred_element_type=jnp.float32) + bq_ref[...]      # (tq, D)
    kv = jnp.dot(enc, wkv_ref[...],
                 preferred_element_type=jnp.float32) + bkv_ref[...]     # (Se, 2D)

    # --- head-batched layout (H, L, hd); head_dim stays the lane dimension.
    q3 = jnp.transpose(q2.astype(in_dt).reshape(tq, H, hd), (1, 0, 2))       # (H, tq, hd)
    k3 = jnp.transpose(kv[:, :D].astype(in_dt).reshape(Se, H, hd), (1, 0, 2))  # (H, Se, hd)
    v3 = jnp.transpose(kv[:, D:].astype(in_dt).reshape(Se, H, hd), (1, 0, 2))  # (H, Se, hd)

    # --- all heads' scores with one batched contraction
    s = jnp.einsum('hqd,hkd->hqk', q3, k3,
                   preferred_element_type=jnp.float32)                  # (H, tq, Se)

    # --- banded NAS mask built in-kernel (no mask array in VMEM/HBM).
    #     Allowed iff col_local <= row and row - col_local <= NAS*5; the
    #     diagonal is always allowed, so no row is ever fully masked (no NaN).
    rows = q_off + jax.lax.broadcasted_iota(jnp.int32, (tq, seq_len), 0)
    cols = jax.lax.broadcasted_iota(jnp.int32, (tq, seq_len), 1)
    allowed = (cols <= rows) & ((rows - cols) <= band)
    bias = jnp.where(allowed, jnp.float32(0.0), jnp.float32(-1e30))     # (tq, S)
    if Se != seq_len:                                                    # get_concat_mask tiling
        bias = jnp.concatenate([bias] * (Se // seq_len), axis=1)         # (tq, Se)
    s = s + bias                                                         # broadcast over heads

    # --- softmax in f32; normalise with the EUP approximate reciprocal
    m = jnp.max(s, axis=-1, keepdims=True)
    p = jnp.exp(s - m)
    l = jnp.sum(p, axis=-1, keepdims=True)
    ctx = jnp.einsum('hqk,hkd->hqd', p.astype(in_dt), v3,
                     preferred_element_type=jnp.float32)                 # (H, tq, hd)
    ctx = ctx * pl.reciprocal(l, approx=True)

    # --- output projection: one (tq, D) @ (D, D) matmul (K = D, lane-dense out)
    ctx2 = jnp.transpose(ctx, (1, 0, 2)).reshape(tq, D).astype(in_dt)
    out = jnp.dot(ctx2, wo_ref[...],
                  preferred_element_type=jnp.float32) + bo_ref[...]
    o_ref[0] = out.astype(o_ref.dtype)


def _pick_q_tile(S):
    for t in (256, 128):
        if S % t == 0:
            return t
    return S


def _vmem_limit_bytes(S, Se, D, heads, tq, itemsize):
    weights = 4 * D * D * itemsize                 # Wq^T, Wkv^T (2D), Wo^T
    biases = 4 * D * 4
    blocks = (S * D + Se * D + tq * D) * itemsize  # x, enc, out blocks
    tmp = ((tq * D + Se * 2 * D) * (4 + itemsize)          # projections + head-split copies
           + 2 * heads * tq * Se * 4                        # scores + probs
           + 2 * tq * D * 4)                                # context
    est = 2 * (weights + biases + blocks) + tmp             # 2x: pipeline double-buffering
    return int(min(64 * 2 ** 20, max(32 * 2 ** 20, int(1.5 * est))))


# ---------------------------------------------------------------------------
# wrapper (mirrors SelfAttention.forward; dropout_rate=0.0 -> identity)
# ---------------------------------------------------------------------------
def self_attention_forward(x, in_proj_weight, in_proj_bias,
                           out_proj_weight, out_proj_bias,
                           *, heads, max_length, encoder_out=None, NAS=20):
    """x: (batch, seq, dim) — same call-side layout as the PyTorch module."""
    B, S, D = x.shape
    assert D % heads == 0
    hd = D // heads
    assert S == max_length, "mask is built with seq_len == max_length"
    cross = encoder_out is not None
    enc = encoder_out if cross else x
    Se = enc.shape[1]
    assert Se % S == 0, "get_concat_mask requires kv_seq to be a multiple of q_seq"
    # TODO(synk): NAS=None would draw a host-side np.random encoding — require explicit NAS.
    assert NAS is not None
    band = int(NAS) * 5

    dt = x.dtype
    scale = 1.0 / math.sqrt(hd)
    # weight prep (outside the kernel, free): fold the softmax scale into Wq/bq,
    # fuse K|V weights, keep everything in the input dtype for the MXU.
    wq_t = (in_proj_weight[:D].T * scale).astype(dt)        # (D, D)
    wkv_t = in_proj_weight[D:].T.astype(dt)                 # (D, 2D)  [K | V]
    wo_t = out_proj_weight.T.astype(dt)                     # (D, D)
    bq = (in_proj_bias[:D] * scale).reshape(1, D).astype(jnp.float32)
    bkv = in_proj_bias[D:].reshape(1, 2 * D).astype(jnp.float32)
    bo = out_proj_bias.reshape(1, D).astype(jnp.float32)

    tq = _pick_q_tile(S)
    nq = S // tq

    kernel = functools.partial(_fused_attn_kernel, heads=heads, head_dim=hd,
                               seq_len=S, tq=tq, band=band, cross=cross)

    const = lambda b, q: (0, 0)      # weights/biases stay VMEM-resident across steps
    w_specs = [
        pl.BlockSpec((D, D), const),         # Wq^T (scaled)
        pl.BlockSpec((D, 2 * D), const),     # Wkv^T
        pl.BlockSpec((D, D), const),         # Wo^T
        pl.BlockSpec((1, D), const),         # bq (scaled)
        pl.BlockSpec((1, 2 * D), const),     # bkv
        pl.BlockSpec((1, D), const),         # bo
    ]
    if cross:
        in_specs = [pl.BlockSpec((1, tq, D), lambda b, q: (b, q, 0)),   # x (query tile)
                    pl.BlockSpec((1, Se, D), lambda b, q: (b, 0, 0)),   # encoder_out
                    ] + w_specs
        args = (x, enc, wq_t, wkv_t, wo_t, bq, bkv, bo)
    else:
        # self-attention: pass x exactly once; the query tile is sliced in-kernel.
        in_specs = [pl.BlockSpec((1, S, D), lambda b, q: (b, 0, 0))] + w_specs
        args = (x, wq_t, wkv_t, wo_t, bq, bkv, bo)

    out = pl.pallas_call(
        kernel,
        out_shape=jax.ShapeDtypeStruct((B, S, D), dt),
        grid_spec=pltpu.PrefetchScalarGridSpec(
            num_scalar_prefetch=0,
            grid=(B, nq),
            in_specs=in_specs,
            out_specs=pl.BlockSpec((1, tq, D), lambda b, q: (b, q, 0)),
        ),
        compiler_params=pltpu.CompilerParams(
            dimension_semantics=("parallel", "parallel"),
            vmem_limit_bytes=_vmem_limit_bytes(S, Se, D, heads, tq, dt.itemsize)),
    )(*args)
    return out


# ---------------------------------------------------------------------------
# pure-JAX reference (same math as nn.MultiheadAttention, eval mode)
# ---------------------------------------------------------------------------
def _reference_forward(x, in_proj_weight, in_proj_bias, out_proj_weight,
                       out_proj_bias, *, heads, max_length,
                       encoder_out=None, NAS=20):
    B, S, D = x.shape
    hd = D // heads
    enc = x if encoder_out is None else encoder_out
    Se = enc.shape[1]
    mask_bool = _get_concat_mask_np(max_length, S, Se, NAS)
    mbias = jnp.asarray(np.where(mask_bool, -1e9, 0.0), jnp.float32)

    q = x @ in_proj_weight[:D].T + in_proj_bias[:D]
    k = enc @ in_proj_weight[D:2 * D].T + in_proj_bias[D:2 * D]
    v = enc @ in_proj_weight[2 * D:].T + in_proj_bias[2 * D:]

    def split(t, L):
        return t.reshape(B, L, heads, hd).transpose(0, 2, 1, 3)

    qh, kh, vh = split(q, S), split(k, Se), split(v, Se)
    s = jnp.einsum('bhqd,bhkd->bhqk', qh, kh) / math.sqrt(hd) + mbias
    p = jax.nn.softmax(s, axis=-1)
    ctx = jnp.einsum('bhqk,bhkd->bhqd', p, vh)
    ctx = ctx.transpose(0, 2, 1, 3).reshape(B, S, D)
    return ctx @ out_proj_weight.T + out_proj_bias


if __name__ == "__main__":
    key = jax.random.PRNGKey(0)
    # batch=2, seq (== max_length)=16, dim_model=256, heads=2 -> head_dim=128
    # (lane-aligned head_dim keeps the in-kernel head split a clean relayout)
    B, S, D, H = 2, 16, 256, 2
    k_x, k_e, k_wi, k_bi, k_wo, k_bo = jax.random.split(key, 6)
    x = jax.random.normal(k_x, (B, S, D), jnp.float32)
    in_w = jax.random.normal(k_wi, (3 * D, D), jnp.float32) / math.sqrt(D)
    in_b = jax.random.normal(k_bi, (3 * D,), jnp.float32) * 0.02
    out_w = jax.random.normal(k_wo, (D, D), jnp.float32) / math.sqrt(D)
    out_b = jax.random.normal(k_bo, (D,), jnp.float32) * 0.02

    TOL = dict(rtol=5e-3, atol=5e-3)   # headroom for MXU accumulation + approx reciprocal

    # self-attention, NAS=1 -> banded mask (self + 5 previous tokens)
    out1 = jax.block_until_ready(
        self_attention_forward(x, in_w, in_b, out_w, out_b,
                               heads=H, max_length=S, NAS=1))
    ref1 = _reference_forward(x, in_w, in_b, out_w, out_b,
                              heads=H, max_length=S, NAS=1)
    assert out1.shape == (B, S, D)
    assert jnp.allclose(out1, ref1, **TOL), float(jnp.max(jnp.abs(out1 - ref1)))

    # self-attention, module default NAS=20 (band wider than S -> plain causal)
    out2 = jax.block_until_ready(
        self_attention_forward(x, in_w, in_b, out_w, out_b,
                               heads=H, max_length=S, NAS=20))
    ref2 = _reference_forward(x, in_w, in_b, out_w, out_b,
                              heads=H, max_length=S, NAS=20)
    assert jnp.allclose(out2, ref2, **TOL), float(jnp.max(jnp.abs(out2 - ref2)))

    # cross-attention with Se = 2*S (get_concat_mask tiles the band along keys)
    enc = jax.random.normal(k_e, (B, 2 * S, D), jnp.float32)
    out3 = jax.block_until_ready(
        self_attention_forward(x, in_w, in_b, out_w, out_b,
                               heads=H, max_length=S, encoder_out=enc, NAS=1))
    ref3 = _reference_forward(x, in_w, in_b, out_w, out_b,
                              heads=H, max_length=S, encoder_out=enc, NAS=1)
    assert jnp.allclose(out3, ref3, **TOL), float(jnp.max(jnp.abs(out3 - ref3)))

    print("KERNEL_OK")
</pallas_src>

<mosaic_0001>
module attributes {stable_mosaic.version = 11 : i64} {
  func.func @_fused_attn_kernel(%arg0: i32, %arg1: i32, %arg2: memref<1x16x256xf32, #tpu.memory_space<vmem>>, %arg3: memref<256x256xf32, #tpu.memory_space<vmem>>, %arg4: memref<256x512xf32, #tpu.memory_space<vmem>>, %arg5: memref<256x256xf32, #tpu.memory_space<vmem>>, %arg6: memref<1x256xf32, #tpu.memory_space<vmem>>, %arg7: memref<1x512xf32, #tpu.memory_space<vmem>>, %arg8: memref<1x256xf32, #tpu.memory_space<vmem>>, %arg9: memref<1x16x256xf32, #tpu.memory_space<vmem>>) attributes {dimension_semantics = [#tpu.dimension_semantics<parallel>, #tpu.dimension_semantics<parallel>], iteration_bounds = array<i64: 2, 1>, scalar_prefetch = 0 : i64, scratch_operands = 0 : i64, tpu.core_type = #tpu.core_type<tc>, window_params = [{transform_indices = @transform_0, window_bounds = array<i64: 1, 16, 256>}, {pipeline_mode = #tpu.pipeline_mode<synchronous>, transform_indices = @transform_1, window_bounds = array<i64: 256, 256>}, {pipeline_mode = #tpu.pipeline_mode<synchronous>, transform_indices = @transform_2, window_bounds = array<i64: 256, 512>}, {pipeline_mode = #tpu.pipeline_mode<synchronous>, transform_indices = @transform_3, window_bounds = array<i64: 256, 256>}, {pipeline_mode = #tpu.pipeline_mode<synchronous>, transform_indices = @transform_4, window_bounds = array<i64: 1, 256>}, {pipeline_mode = #tpu.pipeline_mode<synchronous>, transform_indices = @transform_5, window_bounds = array<i64: 1, 512>}, {pipeline_mode = #tpu.pipeline_mode<synchronous>, transform_indices = @transform_6, window_bounds = array<i64: 1, 256>}, {transform_indices = @transform_7, window_bounds = array<i64: 1, 16, 256>}]} {
    %c16_i32 = arith.constant 16 : i32
    %0 = arith.muli %arg1, %c16_i32 : i32
    %1 = tpu.assume_multiple %0, 16 : i32
    %c0 = arith.constant 0 : index
    %2 = arith.index_cast %1 : i32 to index
    %c0_0 = arith.constant 0 : index
    %3 = vector.load %arg2[%c0, %2, %c0_0] : memref<1x16x256xf32, #tpu.memory_space<vmem>>, vector<1x16x256xf32>
    %4 = vector.shape_cast %3 : vector<1x16x256xf32> to vector<16x256xf32>
    %c0_1 = arith.constant 0 : index
    %c0_2 = arith.constant 0 : index
    %c0_3 = arith.constant 0 : index
    %5 = vector.load %arg2[%c0_1, %c0_2, %c0_3] : memref<1x16x256xf32, #tpu.memory_space<vmem>>, vector<1x16x256xf32>
    %6 = vector.shape_cast %5 : vector<1x16x256xf32> to vector<16x256xf32>
    %c0_4 = arith.constant 0 : index
    %c0_5 = arith.constant 0 : index
    %7 = vector.load %arg3[%c0_4, %c0_5] : memref<256x256xf32, #tpu.memory_space<vmem>>, vector<256x256xf32>
    %cst = arith.constant dense<0.000000e+00> : vector<16x256xf32>
    %8 = tpu.matmul %4, %7, %cst {dimension_numbers = #tpu.dot_dimension_numbers<[1], [0], [0], [1], [0, 0, 1, 1], [], []>} : vector<16x256xf32>, vector<256x256xf32>, vector<16x256xf32> -> vector<16x256xf32>
    %c0_6 = arith.constant 0 : index
    %c0_7 = arith.constant 0 : index
    %9 = vector.load %arg6[%c0_6, %c0_7] : memref<1x256xf32, #tpu.memory_space<vmem>>, vector<1x256xf32>
    %10 = vector.broadcast %9 : vector<1x256xf32> to vector<16x256xf32>
    %11 = arith.addf %8, %10 : vector<16x256xf32>
    %c0_8 = arith.constant 0 : index
    %c0_9 = arith.constant 0 : index
    %12 = vector.load %arg4[%c0_8, %c0_9] : memref<256x512xf32, #tpu.memory_space<vmem>>, vector<256x512xf32>
    %cst_10 = arith.constant dense<0.000000e+00> : vector<16x512xf32>
    %13 = tpu.matmul %6, %12, %cst_10 {dimension_numbers = #tpu.dot_dimension_numbers<[1], [0], [0], [1], [0, 0, 1, 1], [], []>} : vector<16x256xf32>, vector<256x512xf32>, vector<16x512xf32> -> vector<16x512xf32>
    %c0_11 = arith.constant 0 : index
    %c0_12 = arith.constant 0 : index
    %14 = vector.load %arg7[%c0_11, %c0_12] : memref<1x512xf32, #tpu.memory_space<vmem>>, vector<1x512xf32>
    %15 = vector.broadcast %14 : vector<1x512xf32> to vector<16x512xf32>
    %16 = arith.addf %13, %15 : vector<16x512xf32>
    %17 = vector.shape_cast %11 : vector<16x256xf32> to vector<16x2x128xf32>
    %18 = tpu.transpose %17, [1, 0, 2] : vector<16x2x128xf32> -> vector<2x16x128xf32>
    %19 = vector.extract_strided_slice %16 {offsets = [0, 0], sizes = [16, 256], strides = [1, 1]} : vector<16x512xf32> to vector<16x256xf32>
    %20 = vector.shape_cast %19 : vector<16x256xf32> to vector<16x2x128xf32>
    %21 = tpu.transpose %20, [1, 0, 2] : vector<16x2x128xf32> -> vector<2x16x128xf32>
    %22 = vector.extract_strided_slice %16 {offsets = [0, 256], sizes = [16, 256], strides = [1, 1]} : vector<16x512xf32> to vector<16x256xf32>
    %23 = vector.shape_cast %22 : vector<16x256xf32> to vector<16x2x128xf32>
    %24 = tpu.transpose %23, [1, 0, 2] : vector<16x2x128xf32> -> vector<2x16x128xf32>
    "tpu.trace_start"() <{level = 10 : i32, message = "hqd,hkd->hqk"}> : () -> ()
    %cst_13 = arith.constant dense<0.000000e+00> : vector<2x16x16xf32>
    %25 = tpu.matmul %18, %21, %cst_13 {dimension_numbers = #tpu.dot_dimension_numbers<[2], [2], [1], [1], [0, 0, 0, 1, 1, 1], [0], [0]>} : vector<2x16x128xf32>, vector<2x16x128xf32>, vector<2x16x16xf32> -> vector<2x16x16xf32>
    "tpu.trace_stop"() : () -> ()
    %26 = tpu.iota {dimensions = array<i32: 0>} : vector<16x16xi32>
    %27 = vector.broadcast %1 : i32 to vector<16x16xi32>
    %28 = arith.addi %27, %26 : vector<16x16xi32>
    %29 = tpu.iota {dimensions = array<i32: 1>} : vector<16x16xi32>
    %30 = arith.cmpi sle, %29, %28 : vector<16x16xi32>
    %31 = arith.subi %28, %29 : vector<16x16xi32>
    %c5_i32 = arith.constant 5 : i32
    %32 = vector.broadcast %c5_i32 : i32 to vector<16x16xi32>
    %33 = arith.cmpi sle, %31, %32 : vector<16x16xi32>
    %34 = arith.andi %30, %33 : vector<16x16xi1>
    %cst_14 = arith.constant 0.000000e+00 : f32
    %cst_15 = arith.constant -1.000000e+30 : f32
    %35 = vector.broadcast %cst_14 : f32 to vector<16x16xf32>
    %36 = vector.broadcast %cst_15 : f32 to vector<16x16xf32>
    %37 = arith.select %34, %35, %36 : vector<16x16xi1>, vector<16x16xf32>
    %38 = vector.shape_cast %37 : vector<16x16xf32> to vector<1x16x16xf32>
    %39 = vector.broadcast %38 : vector<1x16x16xf32> to vector<2x16x16xf32>
    %40 = arith.addf %25, %39 : vector<2x16x16xf32>
    %cst_16 = arith.constant dense<0xFF800000> : vector<2x16xf32>
    %41 = vector.multi_reduction <maximumf>, %40, %cst_16 [2] : vector<2x16x16xf32> to vector<2x16xf32>
    %42 = vector.shape_cast %41 : vector<2x16xf32> to vector<2x16x1xf32>
    %43 = vector.broadcast %42 : vector<2x16x1xf32> to vector<2x16x16xf32>
    %44 = arith.subf %40, %43 : vector<2x16x16xf32>
    %45 = math.exp %44 : vector<2x16x16xf32>
    %cst_17 = arith.constant dense<0.000000e+00> : vector<2x16xf32>
    %46 = vector.multi_reduction <add>, %45, %cst_17 [2] : vector<2x16x16xf32> to vector<2x16xf32>
    %47 = vector.shape_cast %46 : vector<2x16xf32> to vector<2x16x1xf32>
    "tpu.trace_start"() <{level = 10 : i32, message = "hqk,hkd->hqd"}> : () -> ()
    %cst_18 = arith.constant dense<0.000000e+00> : vector<2x16x128xf32>
    %48 = tpu.matmul %45, %24, %cst_18 {dimension_numbers = #tpu.dot_dimension_numbers<[2], [1], [1], [2], [0, 0, 0, 1, 1, 2], [0], [0]>} : vector<2x16x16xf32>, vector<2x16x128xf32>, vector<2x16x128xf32> -> vector<2x16x128xf32>
    "tpu.trace_stop"() : () -> ()
    %49 = tpu.reciprocal %47 {approx = true} : vector<2x16x1xf32> -> vector<2x16x1xf32>
    %50 = vector.broadcast %49 : vector<2x16x1xf32> to vector<2x16x128xf32>
    %51 = arith.mulf %48, %50 : vector<2x16x128xf32>
    %52 = tpu.transpose %51, [1, 0, 2] : vector<2x16x128xf32> -> vector<16x2x128xf32>
    %53 = vector.shape_cast %52 : vector<16x2x128xf32> to vector<16x256xf32>
    %c0_19 = arith.constant 0 : index
    %c0_20 = arith.constant 0 : index
    %54 = vector.load %arg5[%c0_19, %c0_20] : memref<256x256xf32, #tpu.memory_space<vmem>>, vector<256x256xf32>
    %cst_21 = arith.constant dense<0.000000e+00> : vector<16x256xf32>
    %55 = tpu.matmul %53, %54, %cst_21 {dimension_numbers = #tpu.dot_dimension_numbers<[1], [0], [0], [1], [0, 0, 1, 1], [], []>} : vector<16x256xf32>, vector<256x256xf32>, vector<16x256xf32> -> vector<16x256xf32>
    %c0_22 = arith.constant 0 : index
    %c0_23 = arith.constant 0 : index
    %56 = vector.load %arg8[%c0_22, %c0_23] : memref<1x256xf32, #tpu.memory_space<vmem>>, vector<1x256xf32>
    %57 = vector.broadcast %56 : vector<1x256xf32> to vector<16x256xf32>
    %58 = arith.addf %55, %57 : vector<16x256xf32>
    %c0_24 = arith.constant 0 : index
    %c0_25 = arith.constant 0 : index
    %c0_26 = arith.constant 0 : index
    %59 = vector.load %arg9[%c0_24, %c0_25, %c0_26] : memref<1x16x256xf32, #tpu.memory_space<vmem>>, vector<1x16x256xf32>
    %60 = vector.shape_cast %59 : vector<1x16x256xf32> to vector<16x256xf32>
    %61 = vector.shape_cast %58 : vector<16x256xf32> to vector<1x16x256xf32>
    tpu.vector_store %arg9[%c0_24, %c0_25, %c0_26], %61 {strides = array<i32>} : memref<1x16x256xf32, #tpu.memory_space<vmem>>, vector<1x16x256xf32>,
    return
  }
  func.func @transform_0(%arg0: i32, %arg1: i32) -> (i32, i32, i32) {
    %c0_i32 = arith.constant 0 : i32
    %c0_i32_0 = arith.constant 0 : i32
    %c0_i32_1 = arith.constant 0 : i32
    return %arg0, %c0_i32, %c0_i32_0 : i32, i32, i32
  }
  func.func @transform_1(%arg0: i32, %arg1: i32) -> (i32, i32) {
    %c0_i32 = arith.constant 0 : i32
    %c0_i32_0 = arith.constant 0 : i32
    %c0_i32_1 = arith.constant 0 : i32
    return %c0_i32, %c0_i32_0 : i32, i32
  }
  func.func @transform_2(%arg0: i32, %arg1: i32) -> (i32, i32) {
    %c0_i32 = arith.constant 0 : i32
    %c0_i32_0 = arith.constant 0 : i32
    %c0_i32_1 = arith.constant 0 : i32
    return %c0_i32, %c0_i32_0 : i32, i32
  }
  func.func @transform_3(%arg0: i32, %arg1: i32) -> (i32, i32) {
    %c0_i32 = arith.constant 0 : i32
    %c0_i32_0 = arith.constant 0 : i32
    %c0_i32_1 = arith.constant 0 : i32
    return %c0_i32, %c0_i32_0 : i32, i32
  }
  func.func @transform_4(%arg0: i32, %arg1: i32) -> (i32, i32) {
    %c0_i32 = arith.constant 0 : i32
    %c0_i32_0 = arith.constant 0 : i32
    %c0_i32_1 = arith.constant 0 : i32
    return %c0_i32, %c0_i32_0 : i32, i32
  }
  func.func @transform_5(%arg0: i32, %arg1: i32) -> (i32, i32) {
    %c0_i32 = arith.constant 0 : i32
    %c0_i32_0 = arith.constant 0 : i32
    %c0_i32_1 = arith.constant 0 : i32
    return %c0_i32, %c0_i32_0 : i32, i32
  }
  func.func @transform_6(%arg0: i32, %arg1: i32) -> (i32, i32) {
    %c0_i32 = arith.constant 0 : i32
    %c0_i32_0 = arith.constant 0 : i32
    %c0_i32_1 = arith.constant 0 : i32
    return %c0_i32, %c0_i32_0 : i32, i32
  }
  func.func @transform_7(%arg0: i32, %arg1: i32) -> (i32, i32, i32) {
    %c0_i32 = arith.constant 0 : i32
    %c0_i32_0 = arith.constant 0 : i32
    return %arg0, %arg1, %c0_i32 : i32, i32, i32
  }
}

</mosaic_0001>

<bundles_post_ra>
// kernel: tpu_custom_call.1
= control target key start
LH: loop header
LB: loop body
LE: loop exit
PB: predicated region body
PF: predicated region fallthrough
CT: control target
= control target key end

     0   :  { %s3660_s0 = inlined_call_operand.hbm [shape: f32[2,16,256], index: 0, kind: input, shape index: {}]   ;;  %s3661_s1 = inlined_call_operand.hbm [shape: f32[256,256], index: 1, kind: input, shape index: {}]   ;;  %s3662_s2 = inlined_call_operand.hbm [shape: f32[256,512], index: 2, kind: input, shape index: {}]   ;;  %s3663_s3 = inlined_call_operand.hbm [shape: f32[256,256], index: 3, kind: input, shape index: {}]   ;;  %s3664_s4 = inlined_call_operand.vmem [shape: f32[1,256], index: 4, kind: input, shape index: {}]   ;;  %s3665_s5 = inlined_call_operand.vmem [shape: f32[1,512], index: 5, kind: input, shape index: {}]   ;;  %s3666_s6 = inlined_call_operand.vmem [shape: f32[1,256], index: 6, kind: input, shape index: {}]   ;;  %s3667_s7 = inlined_call_operand.hbm [shape: f32[2,16,256], index: 7, kind: output, shape index: {}]  }
   0x1   :  { %3679 = sst [smem:[#allocation17_spill]] %s3661_s1 }
   0x2   :  { %3680 = sst [smem:[#allocation18_spill]] %s3667_s7 }
   0x3   :  { %12 = vsyncpa [#allocation3], 0 }
   0x4   :  { %14 = vsyncpa [#allocation3 + $0x1], 0 }
   0x5   :  { %15 = vsyncpa [#allocation6], 0 }
   0x6   :  { %16 = vsyncpa [#allocation9], 0 }
   0x7   :  { %17 = vsyncpa [#allocation4], 0 }
   0x8   :  { %19 = vsyncpa [#allocation4 + $0x1], 0  ;;  %s3158_s24 = smov 0   ;;  %s3160_s25 = smov 0  }
   0x9   :  { %s3162_s26 = smov 0   ;;  %s3164_s27 = smov 0  }
   0xa   :  { %s3166_s28 = smov 0   ;;  %s3168_s29 = smov 0  }
   0xb LB: > { %3681 = sst [smem:[#allocation15_spill]] %s3081_s24  ;;  %s2419_s30 = sadd.s32 4294967295, %s3101_s29   ;;  %s3101_s29 = sphi %s3168_s29, %s25_s29   ;;  %s3097_s28 = sphi %s3166_s28, %s3709_s28   ;;  %s3093_s27 = sphi %s3164_s27, %s3708_s27   ;;  %s3089_s26 = sphi %s3162_s26, %s3707_s26   ;;  %s3085_s25 = sphi %s3160_s25, %s3706_s25   ;;  %s3081_s24 = sphi %s3158_s24, %s3705_s24  }
   0xc   : > { %s2420_s8 = sadd.s32 4294967294, %s3101_s29   ;;  %p57_p0 = scmp.ne.s32.totalorder %s3085_s25, %s3081_s24 }
   0xd   : > { %p3192_p1 = scmp.eq.s32.totalorder %s2419_s30, 0  ;;  %p3196_p2 = scmp.eq.s32.totalorder %s2419_s30, 1 }
   0xe   : > { %p215_p3 = scmp.eq.s32.totalorder %s2420_s8, 1  ;;  %p2421_p5 = scmp.ge.s32.totalorder %s3101_s29, 1 }
   0xf   : > { %s3682_s9 = scalar_select %p3192_p1, 1, 0 }
  0x10   : > { %s3683_s10 = scalar_select %p3196_p2, 1, 0 }
  0x11   : > { %p3202_p4 = por %p3192_p1, %p57_p0  ;;  %p3207_p6 = por %p215_p3, %p57_p0 }
  0x12   : > { %p222_p7 = scmp.lt.s32.totalorder %s3101_s29, 3  ;;  %s3103_s14 = smov [#allocation5]  }
  0x13   : > { %s3684_s11 = scalar_select %p3202_p4, 1, 0 }
  0x14   : > { %s3685_s12 = scalar_select %p3207_p6, 1, 0 }
  0x15   : > { %p3212_p8 = pnand %p2421_p5, %p222_p7  ;;  %s234_s15 = sshll.u32 %s3103_s14, 4  ;;  %s3216_s15 = int_to_ptr.vmem [resolvable:$true] %s234_s15 }
  0x16   : > { %3686 = sst [smem:[#allocation16_spill]] %s3685_s12  ;;  %s3104_s17 = smov [#allocation7]  }
  0x17   : > { %s3687_s13 = scalar_select %p3212_p8, 1, 0 }
  0x18   : > { %p2794_p9 = pneg %p3212_p8  ;;  %s247_s18 = sshll.u32 %s3104_s17, 4  ;;  %s3227_s18 = int_to_ptr.vmem [resolvable:$true] %s247_s18 }
  0x19   : > { %s3689_s1 = sld [smem:[#allocation17_spill]] }
  0x1a   : > { %p3223_p11 = pnand %p2794_p9, %p3192_p1 }
  0x1c   : > { %p3237_p13 = pneg %p3223_p11 }
  0x1f   : > { %s2897_s21 = scalar_lea.hbm %s3689_s1, 8192 }
  0x20   : > { %p2898_p12 = scmp.ne.s32.totalorder %s3689_s1, %s2897_s21  ;;  %p2904_p5 = scmp.lt.u32.totalorder %s2897_s21, %s3689_s1 }
  0x22   : > { %p2900_p0 = pnand %p3237_p13, %p2898_p12 }
  0x24   : > { %p2901_p3 = pneg %p2900_p0 }
  0x26   : > { %p2906_p7 = pnand %p2904_p5, %p2901_p3 }
  0x28   : > { %2909 = shalt.err (!%p2906_p7)
}
  0x29   : > { %s2910_s17 = scalar_lea.vmem %s3216_s15, 8192  ;;  %p2918_p1 = scmp.lt.s32.totalorder %s3216_s15, %s3216_s15 }
  0x2a   : > { %p2911_p9 = scmp.ne.s32.totalorder %s3216_s15, %s2910_s17  ;;  %p2919_p4 = scmp.lt.s32.totalorder %s2910_s17, %s2910_s17 }
  0x2c   : > { %p2913_p10 = pnand %p2911_p9, %p3237_p13  ;;  %p2920_p12 = por %p2919_p4, %p2918_p1 }
  0x2e   : > { %p2914_p6 = pneg %p2913_p10 }
  0x30   : > { %p2921_p0 = pnand %p2920_p12, %p2914_p6 }
  0x32   : > { %2924 = shalt.err (!%p2921_p0)
}
  0x33   : > { %s3674_s19 = smov 256   ;;  %s3676_s20 = smov 16  }
  0x34   : > { %2797 = dma.hbm_to_vmem [thread:$0]  (!%p3223_p11), %s3689_s1, 8192, %s3216_s15, [#allocation6], %s3674_s19, %s3674_s19, %s3676_s20  }
  0x35   : > { %s2925_s14 = scalar_lea.hbm %s3662_s2, 16384 }
  0x36   : > { %p2926_p1 = scmp.ne.s32.totalorder %s3662_s2, %s2925_s14  ;;  %p2932_p10 = scmp.lt.u32.totalorder %s2925_s14, %s3662_s2 }
  0x38   : > { %p2928_p4 = pnand %p2926_p1, %p3237_p13 }
  0x3a   : > { %p2929_p6 = pneg %p2928_p4 }
  0x3c   : > { %p2934_p3 = pnand %p2932_p10, %p2929_p6 }
  0x3e   : > { %2937 = shalt.err (!%p2934_p3)
}
  0x3f   : > { %s2938_s15 = scalar_lea.vmem %s3227_s18, 16384  ;;  %p2946_p12 = scmp.lt.s32.totalorder %s3227_s18, %s3227_s18 }
  0x40   : > { %p2939_p5 = scmp.ne.s32.totalorder %s3227_s18, %s2938_s15  ;;  %p2947_p0 = scmp.lt.s32.totalorder %s2938_s15, %s2938_s15 }
  0x42   : > { %p2941_p7 = pnand %p2939_p5, %p3237_p13  ;;  %p2948_p1 = por %p2947_p0, %p2946_p12 }
  0x44   : > { %p2942_p9 = pneg %p2941_p7 }
  0x46   : > { %p2949_p4 = pnand %p2948_p1, %p2942_p9 }
  0x48   : > { %2952 = shalt.err (!%p2949_p4)
}
  0x49   : > { %s3107_s12 = smov 512   ;;  %s3108_s7 = smov 32  }
  0x4a   : > { %2800 = dma.hbm_to_vmem [thread:$0]  (!%p3223_p11), %s3662_s2, 16384, %s3227_s18, [#allocation6], %s3107_s12, %s3107_s12, %s3108_s7  }
  0x4b   : > { %s3109_s22 = smov [#allocation8]   ;;  %s2953_s17 = scalar_lea.hbm %s3663_s3, 8192 }
  0x4c   : > { %s260_s23 = sshll.u32 %s3109_s22, 4  ;;  %p2954_p6 = scmp.ne.s32.totalorder %s3663_s3, %s2953_s17  ;;  %s261_s23 = int_to_ptr.vmem [resolvable:$true] %s260_s23 }
  0x4d   : > { %p2960_p5 = scmp.lt.u32.totalorder %s2953_s17, %s3663_s3 }
  0x4e   : > { %p2956_p10 = pnand %p2954_p6, %p3237_p13 }
  0x50   : > { %p2957_p3 = pneg %p2956_p10 }
  0x52   : > { %p2962_p7 = pnand %p2960_p5, %p2957_p3 }
  0x54   : > { %2965 = shalt.err (!%p2962_p7)
}
  0x55   : > { %s2966_s18 = scalar_lea.vmem %s261_s23, 8192  ;;  %p2974_p1 = scmp.lt.s32.totalorder %s261_s23, %s261_s23 }
  0x56   : > { %p2967_p9 = scmp.ne.s32.totalorder %s261_s23, %s2966_s18  ;;  %p2975_p4 = scmp.lt.s32.totalorder %s2966_s18, %s2966_s18 }
  0x58   : > { %p2969_p12 = pnand %p2967_p9, %p3237_p13  ;;  %p2976_p8 = por %p2975_p4, %p2974_p1 }
  0x5a   : > { %p2970_p0 = pneg %p2969_p12 }
  0x5c   : > { %p2977_p2 = pnand %p2976_p8, %p2970_p0 }
  0x5e   : > { %2980 = shalt.err (!%p2977_p2)
}
  0x5f   : > { %s3691_s19 = smov 16   ;;  %s3692_s12 = smov 256  }
  0x60   : > { %2803 = dma.hbm_to_vmem [thread:$0]  (!%p3223_p11), %s3663_s3, 8192, %s261_s23, [#allocation9], %s3692_s12, %s3692_s12, %s3691_s19  }
  0x61   : > { %s37_s30 = sadd.s32 1, %s3097_s28  ;;  %s44_s16 = sadd.s32 1, %s3089_s26 }
  0x62   : > { %p39_p2 = scmp.ge.s32.totalorder %s37_s30, 2  ;;  %p51_p8 = scmp.ne.s32.totalorder %s3089_s26, %s3085_s25 }
  0x63   : > { %p52_p13 = scmp.eq.s32.totalorder %s3101_s29, 0  ;;  %p3694_p10 = scmp.ne.s32.totalorder %s3683_s10, 0 }
  0x64   : > { %s3711_s30 = smov (%p39_p2, %s37_s30), 0  ;;  %p2815_p11 = scmp.lt.s32.totalorder %s3101_s29, 2 }
  0x65   : > { %p3312_p6 = por %p52_p13, %p51_p8  ;;  %p3318_p3 = por %p3694_p10, %p51_p8 }
  0x66   : > { %s41_s21 = ssub.s32 %s3097_s28, %s3711_s30  ;;  %s283_s22 = sand.u32 1, %s3089_s26  }
  0x67   : > { %p42_p5 = scmp.eq.s32.totalorder %s41_s21, 0  ;;  %s2426_s23 = sshll.u32 %s283_s22, 5 }
  0x68   : > { %s2460_s14 = sshll.u32 %s3097_s28, 9  ;;  %s287_s10 = scalar_lea.vmem [#allocation2], %s2426_s23 }
  0x69   : > { %s3327_s8 = scalar_select %p42_p5, %s3089_s26, %s44_s16  }
  0x6a   : > { %s3333_s18 = scalar_lea.hbm %s3660_s0, %s2460_s14  ;;  %s294_s1 = sshll.u32 %s287_s10, 4  ;;  %s3335_s1 = int_to_ptr.vmem [resolvable:$true] %s294_s1 }
  0x6b   : > { %p3339_p7 = pnand %p2815_p11, %p3312_p6  ;;  %s3343_s16 = scalar_lea.sflag [#allocation3], %s283_s22 }
  0x6c   : > { %s2981_s21 = scalar_lea.hbm %s3333_s18, 512  ;;  %s2986_s7 = scalar_lea.hbm %s3660_s0, 1024 }
  0x6d   : > { %p2982_p9 = scmp.ne.s32.totalorder %s3333_s18, %s2981_s21  ;;  %p2983_p12 = pneg %p3339_p7 }
  0x6e   : > { %p2987_p4 = scmp.lt.u32.totalorder %s3333_s18, %s3660_s0  ;;  %p2988_p2 = scmp.lt.u32.totalorder %s2986_s7, %s2981_s21 }
  0x6f   : > { %p2984_p0 = pnand %p2983_p12, %p2982_p9  ;;  %p2990_p13 = scmp.lt.u32.totalorder %s2981_s21, %s3333_s18 }
  0x70   : > { %p2989_p8 = por %p2988_p2, %p2987_p4 }
  0x71   : > { %p2985_p1 = pneg %p2984_p0 }
  0x72   : > { %p2991_p6 = por %p2990_p13, %p2989_p8 }
  0x74   : > { %p2992_p10 = pnand %p2991_p6, %p2985_p1 }
  0x76   : > { %2995 = shalt.err (!%p2992_p10)
}
  0x77   : > { %s2996_s22 = scalar_lea.vmem %s3335_s1, 512  ;;  %s3110_s10 = smov [#allocation2]  }
  0x78   : > { %p2997_p11 = scmp.ne.s32.totalorder %s3335_s1, %s2996_s22  ;;  %s3001_s23 = sshll.u32 %s3110_s10, 4  ;;  %s3002_s23 = int_to_ptr.vmem [resolvable:$false] %s3001_s23 }
  0x79   : > { %s3003_s14 = scalar_lea.vmem %s3002_s23, 1024  ;;  %p3004_p0 = scmp.lt.s32.totalorder %s3335_s1, %s3002_s23 }
  0x7a   : > { %p2999_p5 = pnand %p2997_p11, %p2983_p12  ;;  %p3005_p4 = scmp.lt.s32.totalorder %s3003_s14, %s2996_s22 }
  0x7c   : > { %p3000_p9 = pneg %p2999_p5  ;;  %p3006_p2 = por %p3005_p4, %p3004_p0 }
  0x7e   : > { %p3007_p8 = pnand %p3006_p2, %p3000_p9 }
  0x80   : > { %3010 = shalt.err (!%p3007_p8)
}
  0x81   : > { %2807 = dma.hbm_to_vmem [thread:$0]  (!%p3339_p7), %s3333_s18, 512, %s3335_s1, %s3343_s16, %s3692_s12, %s3692_s12, %s3691_s19  }
  0x82   : > { %p3697_p12 = scmp.ne.s32.totalorder %s3687_s13, 0 }
  0x83   : > { %s3377_s21 = sand.u32 (!%p3697_p12), 1, %s3085_s25   ;;  %p3698_p1 = scmp.ne.s32.totalorder (!%p3697_p12), %s3684_s11, 0 }
  0x84   : > { %306 = sbr.rel (%p3697_p12) target bundleno = 1319 (0x527), region = 48  ;;  %s2430_s7 = sshll.u32 (!%p3697_p12), %s3377_s21, 5 }
  0x85   : > { %s309_s17 = scalar_lea.sflag (!%p3697_p12), [#allocation3], %s3377_s21  ;;  %s3383_s20 = scalar_lea.vmem (!%p3697_p12), [#allocation2], %s2430_s7 }
  0x8b   : > { %3064 = dma.done.wait (%p3698_p1), %s309_s17, 512  }
  0x8c   : > { %3066 = vsyncadd (%p3698_p1), %s309_s17, 4294966784  ;;  %p3699_p7 = scmp.ne.s32.totalorder %s3682_s9, 0 }
  0x8e   : > { %3068 = dma.done.wait (%p3699_p7), [#allocation6], 24576  }
  0x8f   : > { %3070 = vsyncadd (%p3699_p7), [#allocation6], 4294942720 }
  0x90   : > { %3072 = dma.done.wait (%p3699_p7), [#allocation9], 8192  }
  0x91   : > { %3074 = vsyncadd (%p3699_p7), [#allocation9], 4294959104  ;;  %v524_v0 = vld [vmem:[#allocation7 + $0x8] sm:$0xff]  ;;  %v523_v2 = vld [vmem:[#allocation7] sm:$0xff]  ;;  %vm1691_vm6 = vcmask 130048   ;;  %s354_s1 = scalar_lea.vmem [#allocation10], %s2430_s7 }
  0x92   : > { %v528_v1 = vld [vmem:[#allocation7 + $0x28] sm:$0xff]  ;;  %v527_v4 = vld [vmem:[#allocation7 + $0x20] sm:$0xff]  ;;  %v373_v12 = vld [vmem:[#allocation5 + $0x18] sm:$0xff]  ;;  %s2304_s16 = sshll.u32 %s354_s1, 4  ;;  %s2461_s15 = sshll.u32 %s3093_s27, 9  ;;  %s3606_s16 = int_to_ptr.vmem [resolvable:$true] %s2304_s16 }
  0x93   : > { %v2570_v3 = vpack.c.bf16 %v528_v1, %v524_v0  ;;  %v532_v5 = vld [vmem:[#allocation7 + $0x48] sm:$0xff]  ;;  %v2572_v7 = vpack.c.bf16 %v527_v4, %v523_v2  ;;  %v531_v9 = vld [vmem:[#allocation7 + $0x40] sm:$0xff]  ;;  %v372_v18 = vld [vmem:[#allocation5 + $0x10] sm:$0xff]  ;;  %s3700_s23 = sld [smem:[#allocation18_spill]]  ;;  %s2288_s7 = scalar_lea.sflag [#allocation4], %s3377_s21 }
  0x94   : > { %v536_v6 = vld [vmem:[#allocation7 + $0x68] sm:$0xff]  ;;  %v535_v10 = vld [vmem:[#allocation7 + $0x60] sm:$0xff]  ;;  %v377_v24 = vld [vmem:[#allocation5 + $0x38] sm:$0xff]  ;;  %s3011_s27 = scalar_lea.vmem %s3606_s16, 512  ;;  %s3115_s17 = smov [#allocation10]  }
  0x95   : > { %v2574_v8 = vpack.c.bf16 %v536_v6, %v532_v5  ;;  %v371_v11 = vld [vmem:[#allocation5 + $0x8] sm:$0xff]  ;;  %2571 = vmatprep.subr.bf16.mxu1 %v2570_v3  ;;  %v2576_v15 = vpack.c.bf16 %v535_v10, %v531_v9  ;;  %v370_v17 = vld [vmem:[#allocation5] sm:$0xff]  ;;  %v376_v29 = vld [vmem:[#allocation5 + $0x30] sm:$0xff]  ;;  %p3012_p13 = scmp.ne.s32.totalorder %s3606_s16, %s3011_s27 }
  0x96   : > { %v540_v13 = vld [vmem:[#allocation7 + $0x88] sm:$0xff]  ;;  %2573 = vmatpush1.bf16.msra.mxu1 %v2572_v7  ;;  %v2506_v16 = vpack.c.bf16 %v373_v12, %v371_v11  ;;  %v539_v19 = vld [vmem:[#allocation7 + $0x80] sm:$0xff]  ;;  %v2508_v21 = vpack.c.bf16 %v372_v18, %v370_v17  ;;  %v381_v34 = vld [vmem:[#allocation5 + $0x58] sm:$0xff] }
  0x97   : > { %v544_v14 = vld [vmem:[#allocation7 + $0xa8] sm:$0xff]  ;;  %2575 = vmatprep.subr.bf16.mxu1 %v2574_v8  ;;  %v543_v22 = vld [vmem:[#allocation7 + $0xa0] sm:$0xff]  ;;  %v380_v39 = vld [vmem:[#allocation5 + $0x50] sm:$0xff]  ;;  %p3013_p6 = pnand %p3012_p13, %p3318_p3 }
  0x98   : > { %v2578_v20 = vpack.c.bf16 %v544_v14, %v540_v13  ;;  %v375_v23 = vld [vmem:[#allocation5 + $0x28] sm:$0xff]  ;;  %2507 = vmatprep.subr.bf16.mxu0 %v2506_v16  ;;  %v374_v28 = vld [vmem:[#allocation5 + $0x20] sm:$0xff]  ;;  %v2580_v30 = vpack.c.bf16 %v543_v22, %v539_v19  ;;  %v385_v44 = vld [vmem:[#allocation5 + $0x78] sm:$0xff] }
  0x99   : > { %v2510_v25 = vpack.c.bf16 %v377_v24, %v375_v23  ;;  %v548_v26 = vld [vmem:[#allocation7 + $0xc8] sm:$0xff]  ;;  %2509 = vmatpush1.bf16.msra.mxu0 %v2508_v21  ;;  %v2512_v31 = vpack.c.bf16 %v376_v29, %v374_v28  ;;  %v547_v32 = vld [vmem:[#allocation7 + $0xc0] sm:$0xff]  ;;  %v384_v49 = vld [vmem:[#allocation5 + $0x70] sm:$0xff]  ;;  %s3611_s14 = scalar_lea.hbm %s3700_s23, %s2461_s15  ;;  %p3014_p10 = pneg %p3013_p6 }
  0x9a   : > { %v552_v27 = vld [vmem:[#allocation7 + $0xe8] sm:$0xff]  ;;  %2577 = vmatpush1.bf16.msra.mxu1 %v2576_v15  ;;  %v551_v36 = vld [vmem:[#allocation7 + $0xe0] sm:$0xff]  ;;  %v389_v53 = vld [vmem:[#allocation5 + $0x98] sm:$0xff] }
  0x9b   : > { %2511 = vmatprep.subr.bf16.mxu0 %v2510_v25  ;;  %v379_v33 = vld [vmem:[#allocation5 + $0x48] sm:$0xff]  ;;  %2579 = vmatprep.subr.bf16.mxu1 %v2578_v20  ;;  %v2582_v35 = vpack.c.bf16 %v552_v27, %v548_v26  ;;  %v378_v38 = vld [vmem:[#allocation5 + $0x40] sm:$0xff]  ;;  %v2584_v45 = vpack.c.bf16 %v551_v36, %v547_v32  ;;  %v388_v61 = vld [vmem:[#allocation5 + $0x90] sm:$0xff] }
  0x9c   : > { %v2514_v37 = vpack.c.bf16 %v381_v34, %v379_v33  ;;  %v556_v40 = vld [vmem:[#allocation7 + $0x108] sm:$0xff]  ;;  %v2516_v43 = vpack.c.bf16 %v380_v39, %v378_v38  ;;  %v555_v46 = vld [vmem:[#allocation7 + $0x100] sm:$0xff]  ;;  %v393_v1 = vld [vmem:[#allocation5 + $0xb8] sm:$0xff] }
  0x9d   : > { %v560_v41 = vld [vmem:[#allocation7 + $0x128] sm:$0xff]  ;;  %2513 = vmatpush1.bf16.msra.mxu0 %v2512_v31  ;;  %v382_v48 = vld [vmem:[#allocation5 + $0x60] sm:$0xff]  ;;  %v392_v9 = vld [vmem:[#allocation5 + $0xb0] sm:$0xff] }
  0x9e   : > { %v383_v42 = vld [vmem:[#allocation5 + $0x68] sm:$0xff]  ;;  %2581 = vmatpush1.bf16.msra.mxu1 %v2580_v30  ;;  %2515 = vmatprep.subr.bf16.mxu0 %v2514_v37  ;;  %v2586_v50 = vpack.c.bf16 %v560_v41, %v556_v40  ;;  %v559_v51 = vld [vmem:[#allocation7 + $0x120] sm:$0xff]  ;;  %v2520_v56 = vpack.c.bf16 %v384_v49, %v382_v48  ;;  %v397_v13 = vld [vmem:[#allocation5 + $0xd8] sm:$0xff] }
  0x9f   : > { %v2518_v47 = vpack.c.bf16 %v385_v44, %v383_v42  ;;  %2583 = vmatprep.subr.bf16.mxu1 %v2582_v35  ;;  %v387_v52 = vld [vmem:[#allocation5 + $0x88] sm:$0xff]  ;;  %v2588_v57 = vpack.c.bf16 %v559_v51, %v555_v46  ;;  %v563_v58 = vld [vmem:[#allocation7 + $0x140] sm:$0xff]  ;;  %v396_v21 = vld [vmem:[#allocation5 + $0xd0] sm:$0xff] }
  0xa0   : > { %v564_v54 = vld [vmem:[#allocation7 + $0x148] sm:$0xff]  ;;  %v2522_v59 = vpack.c.bf16 %v389_v53, %v387_v52  ;;  %v386_v60 = vld [vmem:[#allocation5 + $0x80] sm:$0xff]  ;;  %v401_v25 = vld [vmem:[#allocation5 + $0xf8] sm:$0xff] }
  0xa1   : > { %v568_v55 = vld [vmem:[#allocation7 + $0x168] sm:$0xff]  ;;  %2517 = vmatpush1.bf16.msra.mxu0 %v2516_v43  ;;  %v567_v63 = vld [vmem:[#allocation7 + $0x160] sm:$0xff]  ;;  %v2524_v4 = vpack.c.bf16 %v388_v61, %v386_v60  ;;  %v400_v33 = vld [vmem:[#allocation5 + $0xf0] sm:$0xff] }
  0xa2   : > { %2585 = vmatpush1.bf16.msra.mxu1 %v2584_v45  ;;  %2519 = vmatprep.subr.bf16.mxu0 %v2518_v47  ;;  %v2590_v62 = vpack.c.bf16 %v568_v55, %v564_v54  ;;  %v391_v0 = vld [vmem:[#allocation5 + $0xa8] sm:$0xff]  ;;  %v2592_v5 = vpack.c.bf16 %v567_v63, %v563_v58  ;;  %v571_v6 = vld [vmem:[#allocation7 + $0x180] sm:$0xff]  ;;  %v405_v37 = vld [vmem:[#allocation5 + $0x118] sm:$0xff] }
  0xa3   : > { %2587 = vmatprep.subr.bf16.mxu1 %v2586_v50  ;;  %v572_v2 = vld [vmem:[#allocation7 + $0x188] sm:$0xff]  ;;  %v2526_v7 = vpack.c.bf16 %v393_v1, %v391_v0  ;;  %v390_v8 = vld [vmem:[#allocation5 + $0xa0] sm:$0xff]  ;;  %v404_v45 = vld [vmem:[#allocation5 + $0x110] sm:$0xff] }
  0xa4   : > { %v576_v3 = vld [vmem:[#allocation7 + $0x1a8] sm:$0xff]  ;;  %v575_v11 = vld [vmem:[#allocation7 + $0x1a0] sm:$0xff]  ;;  %v2528_v16 = vpack.c.bf16 %v392_v9, %v390_v8  ;;  %v409_v49 = vld [vmem:[#allocation5 + $0x138] sm:$0xff] }
  0xa5   : > { %2521 = vmatpush1.bf16.msra.mxu0 %v2520_v56  ;;  %v2594_v10 = vpack.c.bf16 %v576_v3, %v572_v2  ;;  %v395_v12 = vld [vmem:[#allocation5 + $0xc8] sm:$0xff]  ;;  %v2596_v17 = vpack.c.bf16 %v575_v11, %v571_v6  ;;  %v579_v18 = vld [vmem:[#allocation7 + $0x1c0] sm:$0xff]  ;;  %v413_v61 = vld [vmem:[#allocation5 + $0x158] sm:$0xff] }
  0xa6   : > { %2589 = vmatpush1.bf16.msra.mxu1 %v2588_v57  ;;  %2523 = vmatprep.subr.bf16.mxu0 %v2522_v59  ;;  %v580_v14 = vld [vmem:[#allocation7 + $0x1c8] sm:$0xff]  ;;  %v2530_v19 = vpack.c.bf16 %v397_v13, %v395_v12  ;;  %v394_v20 = vld [vmem:[#allocation5 + $0xc0] sm:$0xff]  ;;  %v408_v57 = vld [vmem:[#allocation5 + $0x130] sm:$0xff] }
  0xa7   : > { %2591 = vmatprep.subr.bf16.mxu1 %v2590_v62  ;;  %v584_v15 = vld [vmem:[#allocation7 + $0x1e8] sm:$0xff]  ;;  %v583_v23 = vld [vmem:[#allocation7 + $0x1e0] sm:$0xff]  ;;  %v2532_v28 = vpack.c.bf16 %v396_v21, %v394_v20 }
  0xa8   : > { %v2598_v22 = vpack.c.bf16 %v584_v15, %v580_v14  ;;  %v399_v24 = vld [vmem:[#allocation5 + $0xe8] sm:$0xff]  ;;  %v2600_v29 = vpack.c.bf16 %v583_v23, %v579_v18  ;;  %v587_v30 = vld [vmem:[#allocation7 + $0x200] sm:$0xff]  ;;  %v416_v18 = vld [vmem:[#allocation5 + $0x170] sm:$0xff] }
  0xa9   : > { %2525 = vmatpush1.bf16.msra.mxu0 %v2524_v4  ;;  %v588_v26 = vld [vmem:[#allocation7 + $0x208] sm:$0xff]  ;;  %v2534_v31 = vpack.c.bf16 %v401_v25, %v399_v24  ;;  %v398_v32 = vld [vmem:[#allocation5 + $0xe0] sm:$0xff] }
  0xaa   : > { %2593 = vmatpush1.bf16.msra.mxu1 %v2592_v5  ;;  %2527 = vmatprep.subr.bf16.mxu0 %v2526_v7  ;;  %v592_v27 = vld [vmem:[#allocation7 + $0x228] sm:$0xff]  ;;  %v591_v35 = vld [vmem:[#allocation7 + $0x220] sm:$0xff]  ;;  %v2536_v40 = vpack.c.bf16 %v400_v33, %v398_v32  ;;  %v412_v5 = vld [vmem:[#allocation5 + $0x150] sm:$0xff] }
  0xab   : > { %2595 = vmatprep.subr.bf16.mxu1 %v2594_v10  ;;  %v2602_v34 = vpack.c.bf16 %v592_v27, %v588_v26  ;;  %v403_v36 = vld [vmem:[#allocation5 + $0x108] sm:$0xff]  ;;  %v2604_v41 = vpack.c.bf16 %v591_v35, %v587_v30  ;;  %v595_v42 = vld [vmem:[#allocation7 + $0x240] sm:$0xff]  ;;  %v417_v10 = vld [vmem:[#allocation5 + $0x178] sm:$0xff] }
  0xac   : > { %v596_v38 = vld [vmem:[#allocation7 + $0x248] sm:$0xff]  ;;  %v2538_v43 = vpack.c.bf16 %v405_v37, %v403_v36  ;;  %v402_v44 = vld [vmem:[#allocation5 + $0x100] sm:$0xff]  ;;  %v420_v30 = vld [vmem:[#allocation5 + $0x190] sm:$0xff] }
  0xad   : > { %2529 = vmatpush1.bf16.msra.mxu0 %v2528_v16  ;;  %v600_v39 = vld [vmem:[#allocation7 + $0x268] sm:$0xff]  ;;  %v599_v47 = vld [vmem:[#allocation7 + $0x260] sm:$0xff]  ;;  %v2540_v52 = vpack.c.bf16 %v404_v45, %v402_v44 }
  0xae   : > { %2597 = vmatpush1.bf16.msra.mxu1 %v2596_v17  ;;  %2531 = vmatprep.subr.bf16.mxu0 %v2530_v19  ;;  %v2606_v46 = vpack.c.bf16 %v600_v39, %v596_v38  ;;  %v407_v48 = vld [vmem:[#allocation5 + $0x128] sm:$0xff]  ;;  %v2608_v53 = vpack.c.bf16 %v599_v47, %v595_v42  ;;  %v603_v54 = vld [vmem:[#allocation7 + $0x280] sm:$0xff]  ;;  %v424_v42 = vld [vmem:[#allocation5 + $0x1b0] sm:$0xff] }
  0xaf   : > { %2599 = vmatprep.subr.bf16.mxu1 %v2598_v22  ;;  %v604_v50 = vld [vmem:[#allocation7 + $0x288] sm:$0xff]  ;;  %v2542_v55 = vpack.c.bf16 %v409_v49, %v407_v48  ;;  %v406_v56 = vld [vmem:[#allocation5 + $0x120] sm:$0xff]  ;;  %v421_v22 = vld [vmem:[#allocation5 + $0x198] sm:$0xff] }
  0xb0   : > { %v608_v51 = vld [vmem:[#allocation7 + $0x2a8] sm:$0xff]  ;;  %v607_v59 = vld [vmem:[#allocation7 + $0x2a0] sm:$0xff]  ;;  %v2544_v0 = vpack.c.bf16 %v408_v57, %v406_v56 }
  0xb1   : > { %2533 = vmatpush1.bf16.msra.mxu0 %v2532_v28  ;;  %v2610_v58 = vpack.c.bf16 %v608_v51, %v604_v50  ;;  %v411_v60 = vld [vmem:[#allocation5 + $0x148] sm:$0xff]  ;;  %v611_v1 = vld [vmem:[#allocation7 + $0x2c0] sm:$0xff]  ;;  %v2612_v2 = vpack.c.bf16 %v607_v59, %v603_v54  ;;  %v428_v54 = vld [vmem:[#allocation5 + $0x1d0] sm:$0xff] }
  0xb2   : > { %2601 = vmatpush1.bf16.msra.mxu1 %v2600_v29  ;;  %2535 = vmatprep.subr.bf16.mxu0 %v2534_v31  ;;  %v612_v62 = vld [vmem:[#allocation7 + $0x2c8] sm:$0xff]  ;;  %v2546_v3 = vpack.c.bf16 %v413_v61, %v411_v60  ;;  %v410_v4 = vld [vmem:[#allocation5 + $0x140] sm:$0xff] }
  0xb3   : > { %2603 = vmatprep.subr.bf16.mxu1 %v2602_v34  ;;  %v616_v63 = vld [vmem:[#allocation7 + $0x2e8] sm:$0xff]  ;;  %v615_v8 = vld [vmem:[#allocation7 + $0x2e0] sm:$0xff]  ;;  %v2548_v13 = vpack.c.bf16 %v412_v5, %v410_v4  ;;  %v425_v34 = vld [vmem:[#allocation5 + $0x1b8] sm:$0xff] }
  0xb4   : > { %v3398_v6 = vld [vmem:[%s3383_s20 + $0x8] sm:$0xff]  ;;  %v2614_v7 = vpack.c.bf16 %v616_v63, %v612_v62  ;;  %v2616_v14 = vpack.c.bf16 %v615_v8, %v611_v1  ;;  %v619_v15 = vld [vmem:[#allocation7 + $0x300] sm:$0xff]  ;;  %v432_v63 = vld [vmem:[#allocation5 + $0x1f0] sm:$0xff] }
  0xb5   : > { %2537 = vmatpush1.bf16.msra.mxu0 %v2536_v40  ;;  %v415_v9 = vld [vmem:[#allocation5 + $0x168] sm:$0xff]  ;;  %737 = vmatprep.mubr.f32.mxu1 %v3398_v6  ;;  %v414_v17 = vld [vmem:[#allocation5 + $0x160] sm:$0xff]  ;;  %v530_v1 = vld [vmem:[#allocation7 + $0x38] sm:$0xff] }
  0xb6   : > { %2605 = vmatpush1.bf16.msra.mxu1 %v2604_v41  ;;  %2539 = vmatprep.subr.bf16.mxu0 %v2538_v43  ;;  %v620_v11 = vld [vmem:[#allocation7 + $0x308] sm:$0xff]  ;;  %v2550_v16 = vpack.c.bf16 %v417_v10, %v415_v9  ;;  %v623_v20 = vld [vmem:[#allocation7 + $0x320] sm:$0xff]  ;;  %v2552_v25 = vpack.c.bf16 %v416_v18, %v414_v17  ;;  %v3406_v5 = vld [vmem:[%s3383_s20 + $0x18] sm:$0xff] }
  0xb7   : > { %2607 = vmatprep.subr.bf16.mxu1 %v2606_v46  ;;  %v624_v12 = vld [vmem:[#allocation7 + $0x328] sm:$0xff]  ;;  %510 = vmatprep.mubr.f32.mxu0 %v3398_v6  ;;  %v2620_v26 = vpack.c.bf16 %v623_v20, %v619_v15  ;;  %v627_v27 = vld [vmem:[#allocation7 + $0x340] sm:$0xff]  ;;  %v429_v46 = vld [vmem:[#allocation5 + $0x1d8] sm:$0xff] }
  0xb8   : > { %v2618_v19 = vpack.c.bf16 %v624_v12, %v620_v11  ;;  %v419_v21 = vld [vmem:[#allocation5 + $0x188] sm:$0xff]  ;;  %v418_v29 = vld [vmem:[#allocation5 + $0x180] sm:$0xff]  ;;  %v529_v8 = vld [vmem:[#allocation7 + $0x30] sm:$0xff] }
  0xb9   : > { %2541 = vmatpush1.bf16.msra.mxu0 %v2540_v52  ;;  %v628_v23 = vld [vmem:[#allocation7 + $0x348] sm:$0xff]  ;;  %v2554_v28 = vpack.c.bf16 %v421_v22, %v419_v21  ;;  %v631_v32 = vld [vmem:[#allocation7 + $0x360] sm:$0xff]  ;;  %v2556_v37 = vpack.c.bf16 %v420_v30, %v418_v29  ;;  %v534_v9 = vld [vmem:[#allocation7 + $0x58] sm:$0xff] }
  0xba   : > { %2609 = vmatpush1.bf16.msra.mxu1 %v2608_v53  ;;  %2543 = vmatprep.subr.bf16.mxu0 %v2542_v55  ;;  %v632_v24 = vld [vmem:[#allocation7 + $0x368] sm:$0xff]  ;;  %v2624_v38 = vpack.c.bf16 %v631_v32, %v627_v27  ;;  %v635_v39 = vld [vmem:[#allocation7 + $0x380] sm:$0xff]  ;;  %v538_v10 = vld [vmem:[#allocation7 + $0x78] sm:$0xff] }
  0xbb   : > { %2611 = vmatprep.subr.bf16.mxu1 %v2610_v58  ;;  %v2622_v31 = vpack.c.bf16 %v632_v24, %v628_v23  ;;  %v423_v33 = vld [vmem:[#allocation5 + $0x1a8] sm:$0xff]  ;;  %v422_v41 = vld [vmem:[#allocation5 + $0x1a0] sm:$0xff]  ;;  %v433_v58 = vld [vmem:[#allocation5 + $0x1f8] sm:$0xff] }
  0xbc   : > { %v636_v35 = vld [vmem:[#allocation7 + $0x388] sm:$0xff]  ;;  %v2558_v40 = vpack.c.bf16 %v425_v34, %v423_v33  ;;  %v639_v44 = vld [vmem:[#allocation7 + $0x3a0] sm:$0xff]  ;;  %v2560_v49 = vpack.c.bf16 %v424_v42, %v422_v41  ;;  %v3411_v11 = vld [vmem:[%s3383_s20 + $0x10] sm:$0xff] }
  0xbd   : > { %2545 = vmatpush1.bf16.msra.mxu0 %v2544_v0  ;;  %v640_v36 = vld [vmem:[#allocation7 + $0x3a8] sm:$0xff]  ;;  %v2628_v50 = vpack.c.bf16 %v639_v44, %v635_v39  ;;  %v643_v51 = vld [vmem:[#allocation7 + $0x3c0] sm:$0xff]  ;;  %v526_v0 = vld [vmem:[#allocation7 + $0x18] sm:$0xff] }
  0xbe   : > { %2613 = vmatpush1.bf16.msra.mxu1 %v2612_v2  ;;  %2547 = vmatprep.subr.bf16.mxu0 %v2546_v3  ;;  %v2626_v43 = vpack.c.bf16 %v640_v36, %v636_v35  ;;  %v427_v45 = vld [vmem:[#allocation5 + $0x1c8] sm:$0xff]  ;;  %v426_v53 = vld [vmem:[#allocation5 + $0x1c0] sm:$0xff]  ;;  %v2634_v4 = vpack.c.bf16 %v530_v1, %v526_v0  ;;  %v537_v15 = vld [vmem:[#allocation7 + $0x70] sm:$0xff] }
  0xbf   : > { %2615 = vmatprep.subr.bf16.mxu1 %v2614_v7  ;;  %v644_v47 = vld [vmem:[#allocation7 + $0x3c8] sm:$0xff]  ;;  %v2562_v52 = vpack.c.bf16 %v429_v46, %v427_v45  ;;  %v647_v56 = vld [vmem:[#allocation7 + $0x3e0] sm:$0xff]  ;;  %v2564_v59 = vpack.c.bf16 %v428_v54, %v426_v53  ;;  %v525_v7 = vld [vmem:[#allocation7 + $0x10] sm:$0xff] }
  0xc0   : > { %v648_v48 = vld [vmem:[#allocation7 + $0x3e8] sm:$0xff]  ;;  %v2632_v60 = vpack.c.bf16 %v647_v56, %v643_v51  ;;  %v430_v62 = vld [vmem:[#allocation5 + $0x1e0] sm:$0xff]  ;;  %v2636_v12 = vpack.c.bf16 %v529_v8, %v525_v7  ;;  %v546_v17 = vld [vmem:[#allocation7 + $0xb8] sm:$0xff] }
  0xc1   : > { %2549 = vmatpush1.bf16.msra.mxu0 %v2548_v13  ;;  %v2630_v55 = vpack.c.bf16 %v648_v48, %v644_v47  ;;  %v431_v57 = vld [vmem:[#allocation5 + $0x1e8] sm:$0xff]  ;;  %v2568_v2 = vpack.c.bf16 %v432_v63, %v430_v62  ;;  %v3403_v3 = vld [vmem:[%s3383_s20] sm:$0xff]  ;;  %v2638_v13 = vpack.c.bf16 %v538_v10, %v534_v9  ;;  %v541_v20 = vld [vmem:[#allocation7 + $0x90] sm:$0xff]  ;;  %s3015_s20 = sshll.u32 %s3115_s17, 4  ;;  %s3016_s20 = int_to_ptr.vmem [resolvable:$false] %s3015_s20 }
  0xc2   : > { %2617 = vmatpush1.bf16.msra.mxu1 %v2616_v14  ;;  %2551 = vmatprep.subr.bf16.mxu0 %v2550_v16  ;;  %v2566_v61 = vpack.c.bf16 %v433_v58, %v431_v57  ;;  %v533_v14 = vld [vmem:[#allocation7 + $0x50] sm:$0xff]  ;;  %v542_v16 = vld [vmem:[#allocation7 + $0x98] sm:$0xff]  ;;  %s3017_s9 = scalar_lea.vmem %s3016_s20, 1024  ;;  %p3018_p11 = scmp.lt.s32.totalorder %s3606_s16, %s3016_s20 }
  0xc3   : > { %2619 = vmatprep.subr.bf16.mxu1 %v2618_v19  ;;  %v2640_v18 = vpack.c.bf16 %v537_v15, %v533_v14  ;;  %v2642_v19 = vpack.c.bf16 %v546_v17, %v542_v16  ;;  %v545_v21 = vld [vmem:[#allocation7 + $0xb0] sm:$0xff]  ;;  %v550_v22 = vld [vmem:[#allocation7 + $0xd8] sm:$0xff]  ;;  %p3019_p5 = scmp.lt.s32.totalorder %s3017_s9, %s3011_s27 }
  0xc4   : > { %v554_v23 = vld [vmem:[#allocation7 + $0xf8] sm:$0xff]  ;;  %v2644_v24 = vpack.c.bf16 %v545_v21, %v541_v20  ;;  %v553_v27 = vld [vmem:[#allocation7 + $0xf0] sm:$0xff] }
  0xc5   : > { %2553 = vmatpush1.bf16.msra.mxu0 %v2552_v25  ;;  %v2646_v25 = vpack.c.bf16 %v554_v23, %v550_v22  ;;  %v562_v29 = vld [vmem:[#allocation7 + $0x138] sm:$0xff]  ;;  %v557_v32 = vld [vmem:[#allocation7 + $0x110] sm:$0xff]  ;;  %p3020_p9 = por %p3019_p5, %p3018_p11 }
  0xc6   : > { %2621 = vmatpush1.bf16.msra.mxu1 %v2620_v26  ;;  %2555 = vmatprep.subr.bf16.mxu0 %v2554_v28  ;;  %v549_v26 = vld [vmem:[#allocation7 + $0xd0] sm:$0xff]  ;;  %v558_v28 = vld [vmem:[#allocation7 + $0x118] sm:$0xff] }
  0xc7   : > { %2623 = vmatprep.subr.bf16.mxu1 %v2622_v31  ;;  %v2648_v30 = vpack.c.bf16 %v553_v27, %v549_v26  ;;  %v2650_v31 = vpack.c.bf16 %v562_v29, %v558_v28  ;;  %v561_v33 = vld [vmem:[#allocation7 + $0x130] sm:$0xff]  ;;  %v566_v34 = vld [vmem:[#allocation7 + $0x158] sm:$0xff]  ;;  %p3021_p0 = pnand %p3020_p9, %p3014_p10 }
  0xc8   : > { %v570_v35 = vld [vmem:[#allocation7 + $0x178] sm:$0xff]  ;;  %v2652_v36 = vpack.c.bf16 %v561_v33, %v557_v32  ;;  %v577_v44 = vld [vmem:[#allocation7 + $0x1b0] sm:$0xff] }
  0xc9   : > { %2557 = vmatpush1.bf16.msra.mxu0 %v2556_v37  ;;  %v565_v37 = vld [vmem:[#allocation7 + $0x150] sm:$0xff]  ;;  %v574_v39 = vld [vmem:[#allocation7 + $0x198] sm:$0xff] }
  0xca   : > { %2625 = vmatpush1.bf16.msra.mxu1 %v2624_v38  ;;  %2559 = vmatprep.subr.bf16.mxu0 %v2558_v40  ;;  %v569_v38 = vld [vmem:[#allocation7 + $0x170] sm:$0xff]  ;;  %v578_v40 = vld [vmem:[#allocation7 + $0x1b8] sm:$0xff] }
  0xcb   : > { %2627 = vmatprep.subr.bf16.mxu1 %v2626_v43  ;;  %v2656_v41 = vpack.c.bf16 %v569_v38, %v565_v37  ;;  %v2658_v42 = vpack.c.bf16 %v578_v40, %v574_v39  ;;  %v573_v43 = vld [vmem:[#allocation7 + $0x190] sm:$0xff]  ;;  %v582_v45 = vld [vmem:[#allocation7 + $0x1d8] sm:$0xff]  ;;  %v436_v39 = vlaneseq }
  0xcc   : > { %v586_v46 = vld [vmem:[#allocation7 + $0x1f8] sm:$0xff]  ;;  %v2660_v47 = vpack.c.bf16 %v577_v44, %v573_v43  ;;  %v593_v56 = vld [vmem:[#allocation7 + $0x230] sm:$0xff]  ;;  %v3430_v44 = vld [vmem:[%s3665_s5] sm:$0xf] }
  0xcd   : > { %2561 = vmatpush1.bf16.msra.mxu0 %v2560_v49  ;;  %v2662_v48 = vpack.c.bf16 %v586_v46, %v582_v45  ;;  %v581_v49 = vld [vmem:[#allocation7 + $0x1d0] sm:$0xff]  ;;  %v590_v51 = vld [vmem:[#allocation7 + $0x218] sm:$0xff]  ;;  %v3422_v40 = vshrl.u32 %v436_v39, 7  ;;  %v3112_v45 = vmov 1934713408  }
  0xce   : > { %2629 = vmatpush1.bf16.msra.mxu1 %v2628_v50  ;;  %2563 = vmatprep.subr.bf16.mxu0 %v2562_v52  ;;  %v585_v50 = vld [vmem:[#allocation7 + $0x1f0] sm:$0xff]  ;;  %v594_v52 = vld [vmem:[#allocation7 + $0x238] sm:$0xff] }
  0xcf   : > { %2631 = vmatprep.subr.bf16.mxu1 %v2630_v55  ;;  %v2664_v53 = vpack.c.bf16 %v585_v50, %v581_v49  ;;  %v2666_v54 = vpack.c.bf16 %v594_v52, %v590_v51  ;;  %v589_v55 = vld [vmem:[#allocation7 + $0x210] sm:$0xff]  ;;  %v598_v57 = vld [vmem:[#allocation7 + $0x258] sm:$0xff]  ;;  %v3425_v43 = vsub.s32 0, %v3422_v40 }
  0xd0   : > { %v602_v58 = vld [vmem:[#allocation7 + $0x278] sm:$0xff]  ;;  %v601_v62 = vld [vmem:[#allocation7 + $0x270] sm:$0xff] }
  0xd1   : > { %2565 = vmatpush1.bf16.msra.mxu0 %v2564_v59  ;;  %v2668_v59 = vpack.c.bf16 %v593_v56, %v589_v55  ;;  %v606_v63 = vld [vmem:[#allocation7 + $0x298] sm:$0xff]  ;;  %v609_v7 = vld [vmem:[#allocation7 + $0x2b0] sm:$0xff]  ;;  %v656_v46 = vrot.slane %v3430_v44, %v3425_v43 }
  0xd2   : > { %2633 = vmatpush1.bf16.msra.mxu1 %v2632_v60  ;;  %2567 = vmatprep.subr.bf16.mxu0 %v2566_v61  ;;  %v2670_v60 = vpack.c.bf16 %v602_v58, %v598_v57  ;;  %v597_v61 = vld [vmem:[#allocation7 + $0x250] sm:$0xff]  ;;  %v610_v0 = vld [vmem:[#allocation7 + $0x2b8] sm:$0xff]  ;;  %v3113_v57 = vmov 0.0  }
  0xd3   : > { %v2672_v1 = vpack.c.bf16 %v601_v62, %v597_v61  ;;  %v614_v9 = vld [vmem:[#allocation7 + $0x2d8] sm:$0xff]  ;;  %v617_v14 = vld [vmem:[#allocation7 + $0x2f0] sm:$0xff] }
  0xd4   : > { %v618_v10 = vld [vmem:[#allocation7 + $0x2f8] sm:$0xff]  ;;  %v625_v20 = vld [vmem:[#allocation7 + $0x330] sm:$0xff] }
  0xd5   : > { %738 = vmatmul.mubr.f32.vlgmr.msra.gmra.mrb[0].mxu1 %v3403_v3  ;;  %2569 = vmatpush1.bf16.msra.mxu0 %v2568_v2  ;;  %v2674_v2 = vpack.c.bf16 %v610_v0, %v606_v63  ;;  %v622_v16 = vld [vmem:[#allocation7 + $0x318] sm:$0xff]  ;;  %v633_v26 = vld [vmem:[#allocation7 + $0x370] sm:$0xff] }
  0xd6   : > { %743 = vmatprep.mubr.f32.mxu1 %v3406_v5  ;;  %2635 = vmatprep.subr.bf16.mxu0 %v2634_v4  ;;  %v605_v4 = vld [vmem:[#allocation7 + $0x290] sm:$0xff]  ;;  %v626_v17 = vld [vmem:[#allocation7 + $0x338] sm:$0xff] }
  0xd7   : > { %v2676_v8 = vpack.c.bf16 %v609_v7, %v605_v4  ;;  %v630_v22 = vld [vmem:[#allocation7 + $0x358] sm:$0xff]  ;;  %v641_v32 = vld [vmem:[#allocation7 + $0x3b0] sm:$0xff] }
  0xd8   : > { %511 = vmatmul.mubr.f32.vlgmr.msra.gmra.mrb[0].mxu0 %v3403_v3  ;;  %v634_v23 = vld [vmem:[#allocation7 + $0x378] sm:$0xff]  ;;  %v649_v37 = vld [vmem:[#allocation7 + $0x3f0] sm:$0xff] }
  0xd9   : > { %744 = vmatmul.mubr.f32.gmra.mrb[2].mxu1 %v3411_v11  ;;  %516 = vmatprep.mubr.f32.mxu0 %v3406_v5  ;;  %v638_v28 = vld [vmem:[#allocation7 + $0x398] sm:$0xff] }
  0xda   : > { %2637 = vmatpush1.bf16.msra.mxu0 %v2636_v12  ;;  %v2678_v12 = vpack.c.bf16 %v618_v10, %v614_v9  ;;  %v642_v29 = vld [vmem:[#allocation7 + $0x3b8] sm:$0xff] }
  0xdb   : > { %2639 = vmatprep.subr.bf16.mxu0 %v2638_v13  ;;  %v613_v13 = vld [vmem:[#allocation7 + $0x2d0] sm:$0xff] }
  0xdc   : > { %517 = vmatmul.mubr.f32.gmra.mrb[2].mxu0 %v3411_v11  ;;  %v2680_v15 = vpack.c.bf16 %v617_v14, %v613_v13 }
  0xdd   : > { %814 = vmatprep.mubr.f32.mxu0 %v3398_v6  ;;  %v2654_v6 = vpack.c.bf16 %v570_v35, %v566_v34  ;;  %v646_v34 = vld [vmem:[#allocation7 + $0x3d8] sm:$0xff] }
  0xde   : > { %2641 = vmatpush1.bf16.msra.mxu0 %v2640_v18  ;;  %v2682_v18 = vpack.c.bf16 %v626_v17, %v622_v16  ;;  %v650_v35 = vld [vmem:[#allocation7 + $0x3f8] sm:$0xff] }
  0xdf   : > { %2643 = vmatprep.subr.bf16.mxu0 %v2642_v19  ;;  %v621_v19 = vld [vmem:[#allocation7 + $0x310] sm:$0xff] }
  0xe0   : > { %v2684_v21 = vpack.c.bf16 %v625_v20, %v621_v19 }
  0xe2   : > { %2645 = vmatpush1.bf16.msra.mxu0 %v2644_v24  ;;  %v2686_v24 = vpack.c.bf16 %v634_v23, %v630_v22 }
  0xe3   : > { %2647 = vmatprep.subr.bf16.mxu0 %v2646_v25  ;;  %v629_v25 = vld [vmem:[#allocation7 + $0x350] sm:$0xff] }
  0xe4   : > { %v2688_v27 = vpack.c.bf16 %v633_v26, %v629_v25 }
  0xe6   : > { %2649 = vmatpush1.bf16.msra.mxu0 %v2648_v30  ;;  %v2690_v30 = vpack.c.bf16 %v642_v29, %v638_v28 }
  0xe7   : > { %2651 = vmatprep.subr.bf16.mxu0 %v2650_v31  ;;  %v637_v31 = vld [vmem:[#allocation7 + $0x390] sm:$0xff] }
  0xe8   : > { %v2692_v33 = vpack.c.bf16 %v641_v32, %v637_v31 }
  0xea   : > { %2653 = vmatpush1.bf16.msra.mxu0 %v2652_v36  ;;  %v2694_v36 = vpack.c.bf16 %v650_v35, %v646_v34 }
  0xeb   : > { %2655 = vmatprep.subr.bf16.mxu0 %v2654_v6  ;;  %v645_v6 = vld [vmem:[#allocation7 + $0x3d0] sm:$0xff] }
  0xec   : > { %v2696_v38 = vpack.c.bf16 %v649_v37, %v645_v6 }
  0xee   : > { %2657 = vmatpush1.bf16.msra.mxu0 %v2656_v41  ;;  %v3111_v41 = vmov 1983009808  }
  0xef   : > { %2659 = vmatprep.subr.bf16.mxu0 %v2658_v42  ;;  %v829_v42 = vunpack.c.l.s4 %v3111_v41 }
  0xf2   : > { %2661 = vmatpush1.bf16.msra.mxu0 %v2660_v47  ;;  %v434_v47 = vld [vmem:[%s3664_s4] sm:$0x3] }
  0xf3   : > { %2663 = vmatprep.subr.bf16.mxu0 %v2662_v48  ;;  %v439_v52 = vrot.slane %v434_v47, %v3425_v43 }
  0xf6   : > { %2665 = vmatpush1.bf16.msra.mxu0 %v2664_v53 }
  0xf7   : > { %2667 = vmatprep.subr.bf16.mxu0 %v2666_v54 }
  0xfa   : > { %2669 = vmatpush1.bf16.msra.mxu0 %v2668_v59 }
  0xfb   : > { %2671 = vmatprep.subr.bf16.mxu0 %v2670_v60 }
  0xfe   : > { %2673 = vmatpush1.bf16.msra.mxu0 %v2672_v1 }
  0xff   : > { %2675 = vmatprep.subr.bf16.mxu0 %v2674_v2 }
 0x102   : > { %2677 = vmatpush1.bf16.msra.mxu0 %v2676_v8 }
 0x103   : > { %2679 = vmatprep.subr.bf16.mxu0 %v2678_v12 }
 0x106   : > { %2681 = vmatpush1.bf16.msra.mxu0 %v2680_v15 }
 0x107   : > { %2683 = vmatprep.subr.bf16.mxu0 %v2682_v18 }
 0x10a   : > { %2685 = vmatpush1.bf16.msra.mxu0 %v2684_v21 }
 0x10b   : > { %2687 = vmatprep.subr.bf16.mxu0 %v2686_v24 }
 0x10e   : > { %2689 = vmatpush1.bf16.msra.mxu0 %v2688_v27 }
 0x10f   : > { %2691 = vmatprep.subr.bf16.mxu0 %v2690_v30 }
 0x112   : > { %2693 = vmatpush1.bf16.msra.mxu0 %v2692_v33 }
 0x113   : > { %2695 = vmatprep.subr.bf16.mxu0 %v2694_v36 }
 0x116   : > { %2697 = vmatpush1.bf16.msra.mxu0 %v2696_v38 }
 0x119   : > { %815 = vmatmul.mubr.f32.vlgmr.msra.gmra.mrb[4].mxu0 %v3403_v3  ;;  %v3433_v3 = vsub.s32 1, %v3422_v40 }
 0x11a   : > { %820 = vmatprep.mubr.f32.mxu0 %v3406_v5  ;;  %v830_v5 = vunpack.c.0.s8 %v829_v42 }
 0x11b   : > { %v660_v48 = vrot.slane %v3430_v44, %v3433_v3  ;;  %v443_v55 = vrot.slane %v434_v47, %v3433_v3 }
 0x11c   : > { %v3443_v49 = vsub.s32 %v830_v5, %v3422_v40 }
 0x11d   : > { %821 = vmatmul.mubr.f32.gmra.mrb[6].mxu0 %v3411_v11  ;;  %v860_v11 = vunpack.c.l.s4 %v3112_v45 }
 0x11f   : > { %v861_v51 = vunpack.c.0.s8 %v860_v11 }
 0x121   : > { %v3450_v61 = vsub.s32 %v861_v51, %v3422_v40 }
 0x1a8   : > { %v739_v50 = vpop.f32.mrb[0].mxu1 }
 0x1a9   : > { %v740_v53 = vadd.f32 %v739_v50, %v656_v46  ;;  %v741_v54 = vpop.f32.mrb[1].mxu1 }
 0x1aa   : > { %v742_v56 = vadd.f32 %v741_v54, %v660_v48 }
 0x1ab   : > { %v1059_v58 = vcombine.high %v740_v53, %v3113_v57  ;;  %v1066_v59 = vrot.slane %v740_v53, %v3443_v49  ;;  %v512_v60 = vpop.f32.mrb[0].mxu0 }
 0x1ac   : > { %v1074_v62 = vcombine.high %v742_v56, %v3113_v57  ;;  %v1081_v63 = vrot.slane %v742_v56, %v3443_v49  ;;  %v745_v0 = vpop.f32.mrb[2].mxu1  ;;  %v513_v1 = vadd.f32 %v512_v60, %v439_v52  ;;  %v514_v2 = vpop.f32.mrb[1].mxu0 }
 0x1ad   : > { %v1073_v4 = vrot.slane %v1059_v58, %v3443_v49  ;;  %v746_v7 = vadd.f32 %v745_v0, %v656_v46  ;;  %v747_v8 = vpop.f32.mrb[3].mxu1  ;;  %v515_v9 = vadd.f32 %v514_v2, %v443_v55 }
 0x1ae   : > { %v1088_v10 = vrot.slane %v1074_v62, %v3443_v49  ;;  %v1089_v12 = vcombine.low %v1066_v59, %v1081_v63  ;;  %v1090_v13 = vcombine.high %v1066_v59, %v1081_v63  ;;  %v748_v14 = vadd.f32 %v747_v8, %v660_v48 }
 0x1af   : > { %v1125_v15 = vcombine.high %v746_v7, %v3113_v57  ;;  %v1132_v16 = vrot.slane %v746_v7, %v3443_v49  ;;  %v827_v17 = vcombine.high %v513_v1, %v3113_v57  ;;  %v834_v18 = vrot.slane %v513_v1, %v3443_v49  ;;  %v518_v19 = vpop.f32.mrb[2].mxu0 }
 0x1b0   : > { %v1097_v20 = vrot.slane %v1089_v12, %v3450_v61  ;;  %v1104_v21 = vrot.slane %v1090_v13, %v3450_v61  ;;  %v1105_v22 = vcombine.low %v1073_v4, %v1088_v10  ;;  %v1106_v23 = vcombine.high %v1073_v4, %v1088_v10  ;;  %v520_v24 = vpop.f32.mrb[3].mxu0 }
 0x1b1   : > { %v1139_v25 = vrot.slane %v1125_v15, %v3443_v49  ;;  %v1140_v26 = vcombine.high %v748_v14, %v3113_v57  ;;  %v1147_v27 = vrot.slane %v748_v14, %v3443_v49  ;;  %v841_v28 = vrot.slane %v827_v17, %v3443_v49 }
 0x1b2   : > { %v1113_v29 = vrot.slane %v1105_v22, %v3450_v61  ;;  %v1120_v30 = vrot.slane %v1106_v23, %v3450_v61  ;;  %v1191_v31 = vcombine.low %v1097_v20, %v1104_v21  ;;  %v2439_v32 = vcombine.high %v1097_v20, %v1104_v21 }
 0x1b3   : > { %v1154_v33 = vrot.slane %v1140_v26, %v3443_v49  ;;  %v1155_v34 = vcombine.low %v1132_v16, %v1147_v27  ;;  %v1156_v35 = vcombine.high %v1132_v16, %v1147_v27  ;;  %v842_v36 = vcombine.high %v515_v9, %v3113_v57 }
 0x1b4   : > { %v1198_v6 = vrot.slane %v1191_v31, %v3443_v49  ;;  %v1206_v37 = vrot.slane %v2439_v32, %v3443_v49  ;;  %v1207_v38 = vcombine.low %v1113_v29, %v1120_v30  ;;  %v2440_v41 = vcombine.high %v1113_v29, %v1120_v30 }
 0x1b5   : > { %v1163_v42 = vrot.slane %v1155_v34, %v3450_v61  ;;  %v1170_v5 = vrot.slane %v1156_v35, %v3450_v61  ;;  %v1171_v45 = vcombine.low %v1139_v25, %v1154_v33  ;;  %v1172_v11 = vcombine.high %v1139_v25, %v1154_v33 }
 0x1b6   : > { %v849_v46 = vrot.slane %v515_v9, %v3443_v49  ;;  %v856_v47 = vrot.slane %v842_v36, %v3443_v49  ;;  %v519_v48 = vadd.f32 %v518_v19, %v439_v52  ;;  %v521_v50 = vadd.f32 %v520_v24, %v443_v55 }
 0x1b7   : > { %v1179_v51 = vrot.slane %v1171_v45, %v3450_v61  ;;  %v1186_v53 = vrot.slane %v1172_v11, %v3450_v61  ;;  %v1241_v54 = vcombine.low %v1163_v42, %v1170_v5  ;;  %v2441_v56 = vcombine.high %v1163_v42, %v1170_v5 }
 0x1b8   : > { %v857_v58 = vcombine.low %v834_v18, %v849_v46  ;;  %v858_v59 = vcombine.high %v834_v18, %v849_v46  ;;  %v873_v60 = vcombine.low %v841_v28, %v856_v47  ;;  %v874_v62 = vcombine.high %v841_v28, %v856_v47 }
 0x1b9   : > { %v1248_v63 = vrot.slane %v1241_v54, %v3443_v49  ;;  %v1256_v0 = vrot.slane %v2441_v56, %v3443_v49  ;;  %v1257_v1 = vcombine.low %v1179_v51, %v1186_v53  ;;  %v2442_v2 = vcombine.high %v1179_v51, %v1186_v53 }
 0x1ba   : > { %v865_v4 = vrot.slane %v857_v58, %v3450_v61  ;;  %v872_v52 = vrot.slane %v858_v59, %v3450_v61  ;;  %v881_v55 = vrot.slane %v873_v60, %v3450_v61  ;;  %v888_v7 = vrot.slane %v874_v62, %v3450_v61 }
 0x1bb   : > { %v893_v8 = vcombine.high %v519_v48, %v3113_v57  ;;  %v900_v9 = vrot.slane %v519_v48, %v3443_v49  ;;  %v908_v10 = vcombine.high %v521_v50, %v3113_v57  ;;  %v915_v12 = vrot.slane %v521_v50, %v3443_v49 }
 0x1bc   : > { %v959_v13 = vcombine.low %v865_v4, %v872_v52  ;;  %v2435_v14 = vcombine.high %v865_v4, %v872_v52  ;;  %v975_v15 = vcombine.low %v881_v55, %v888_v7  ;;  %v2436_v16 = vcombine.high %v881_v55, %v888_v7 }
 0x1bd   : > { %v907_v17 = vrot.slane %v893_v8, %v3443_v49  ;;  %v922_v18 = vrot.slane %v908_v10, %v3443_v49  ;;  %v923_v19 = vcombine.low %v900_v9, %v915_v12  ;;  %v924_v20 = vcombine.high %v900_v9, %v915_v12 }
 0x1be   : > { %v1214_v21 = vrot.slane %v1207_v38, %v3443_v49  ;;  %v1222_v22 = vrot.slane %v2440_v41, %v3443_v49  ;;  %v1223_v23 = vcombine.low %v1198_v6, %v1206_v37  ;;  %v1264_v24 = vrot.slane %v1257_v1, %v3443_v49 }
 0x1bf   : > { %v931_v25 = vrot.slane %v923_v19, %v3450_v61  ;;  %v938_v26 = vrot.slane %v924_v20, %v3450_v61  ;;  %v939_v27 = vcombine.low %v907_v17, %v922_v18  ;;  %v940_v28 = vcombine.high %v907_v17, %v922_v18 }
 0x1c0   : > { %v1230_v29 = vrot.slane %v1223_v23, %v3450_v61  ;;  %v1231_v30 = vcombine.low %v1214_v21, %v1222_v22  ;;  %v1272_v31 = vrot.slane %v2442_v2, %v3443_v49  ;;  %v1273_v32 = vcombine.low %v1248_v63, %v1256_v0 }
 0x1c1   : > { %v947_v33 = vrot.slane %v939_v27, %v3450_v61  ;;  %v954_v34 = vrot.slane %v940_v28, %v3450_v61  ;;  %v1009_v35 = vcombine.low %v931_v25, %v938_v26  ;;  %v2437_v36 = vcombine.high %v931_v25, %v938_v26 }
 0x1c2   : > { %v1238_v6 = vrot.slane %v1231_v30, %v3450_v61  ;;  %v1280_v37 = vrot.slane %v1273_v32, %v3450_v61  ;;  %v1281_v38 = vcombine.low %v1264_v24, %v1272_v31  ;;  %v966_v41 = vrot.slane %v959_v13, %v3443_v49 }
 0x1c3   : > { %v1016_v42 = vrot.slane %v1009_v35, %v3443_v49  ;;  %v1024_v5 = vrot.slane %v2437_v36, %v3443_v49  ;;  %v1025_v45 = vcombine.low %v947_v33, %v954_v34  ;;  %v2438_v11 = vcombine.high %v947_v33, %v954_v34 }
 0x1c4   : > { %v1239_v46 = vcombine.low %v1230_v29, %v1238_v6  ;;  %v1288_v47 = vrot.slane %v1281_v38, %v3450_v61  ;;  %v974_v48 = vrot.slane %v2435_v14, %v3443_v49  ;;  %v982_v50 = vrot.slane %v975_v15, %v3443_v49 }
 0x1c5   : > { %v1032_v51 = vrot.slane %v1025_v45, %v3443_v49  ;;  %v1040_v53 = vrot.slane %v2438_v11, %v3443_v49  ;;  %v1041_v54 = vcombine.low %v1016_v42, %v1024_v5  ;;  %v990_v56 = vrot.slane %v2436_v16, %v3443_v49 }
 0x1c6   : > { %v1289_v58 = vcombine.low %v1280_v37, %v1288_v47  ;;  %v991_v59 = vcombine.low %v966_v41, %v974_v48  ;;  %v1240_v60 = vcombine.high %v1230_v29, %v1238_v6  ;;  %v1290_v62 = vcombine.high %v1280_v37, %v1288_v47 }
 0x1c7   : > { %v1049_v63 = vcombine.low %v1032_v51, %v1040_v53  ;;  %v999_v0 = vcombine.low %v982_v50, %v990_v56  ;;  %v1048_v1 = vrot.slane %v1041_v54, %v3450_v61  ;;  %v663_v13 = vsub.s32 2, %v3422_v40 }
 0x1c8   : > { %v2698_v2 = vpack.c.bf16 %v1289_v58, %v1239_v46  ;;  %v998_v4 = vrot.slane %v991_v59, %v3450_v61  ;;  %v2702_v52 = vpack.c.bf16 %v1290_v62, %v1240_v60  ;;  %v667_v14 = vsub.s32 3, %v3422_v40 }
 0x1c9   : > { %v1006_v55 = vrot.slane %v999_v0, %v3450_v61  ;;  %v1056_v7 = vrot.slane %v1049_v63, %v3450_v61  ;;  %v664_v15 = vrot.slane %v3430_v44, %v663_v13 }
 0x1ca   : > { %2699 = vmatprep.subr.bf16.mxu0 %v2698_v2  ;;  %v668_v16 = vrot.slane %v3430_v44, %v667_v14 }
 0x1cb   : > { %2701 = vmatpush3.bf16.xpose.msra.mxu0 %v2698_v2  ;;  %v1007_v8 = vcombine.low %v998_v4, %v1006_v55  ;;  %v1057_v9 = vcombine.low %v1048_v1, %v1056_v7  ;;  %v1008_v10 = vcombine.high %v998_v4, %v1006_v55  ;;  %v1058_v12 = vcombine.high %v1048_v1, %v1056_v7 }
 0x1cc   : > { %2703 = vmatprep.subr.bf16.mxu0 %v2702_v52 }
 0x1cd   : > { %2482 = vmatprep.mubr.f32.mxu0 %v1007_v8 }
 0x1d2   : > { %2483 = vmatmul.mubr.f32.vlgmr.msra.gmra.mrb[8].mxu0 %v1057_v9 }
 0x1d3   : > { %2705 = vmatpush3.bf16.xpose.msra.mxu0 %v2702_v52  ;;  %2489 = vmatprep.mubr.f32.mxu0 %v1008_v10 }
 0x1da   : > { %2490 = vmatmul.mubr.f32.vlgmr.msra.gmra.mrb[10].mxu0 %v1058_v12 }
 0x1ec   : > { %v816_v17 = vpop.f32.mrb[4].mxu0 }
 0x1ed   : > { %v817_v18 = vadd.f32 %v816_v17, %v664_v15  ;;  %v818_v19 = vpop.f32.mrb[5].mxu0 }
 0x1ee   : > { %v819_v20 = vadd.f32 %v818_v19, %v668_v16 }
 0x1ef   : > { %v1291_v21 = vcombine.high %v817_v18, %v3113_v57  ;;  %v1298_v22 = vrot.slane %v817_v18, %v3443_v49 }
 0x1f0   : > { %v1306_v23 = vcombine.high %v819_v20, %v3113_v57  ;;  %v1313_v24 = vrot.slane %v819_v20, %v3443_v49  ;;  %v822_v25 = vpop.f32.mrb[6].mxu0 }
 0x1f1   : > { %v1305_v26 = vrot.slane %v1291_v21, %v3443_v49  ;;  %v823_v27 = vadd.f32 %v822_v25, %v664_v15  ;;  %v824_v28 = vpop.f32.mrb[7].mxu0 }
 0x1f2   : > { %v1320_v29 = vrot.slane %v1306_v23, %v3443_v49  ;;  %v1321_v44 = vcombine.low %v1298_v22, %v1313_v24  ;;  %v1322_v30 = vcombine.high %v1298_v22, %v1313_v24  ;;  %v825_v31 = vadd.f32 %v824_v28, %v668_v16 }
 0x1f3   : > { %v1357_v32 = vcombine.high %v823_v27, %v3113_v57  ;;  %v1364_v33 = vrot.slane %v823_v27, %v3443_v49  ;;  %v1525_v27 = vadd.s32 8, %v3422_v40 }
 0x1f4   : > { %v1329_v34 = vrot.slane %v1321_v44, %v3450_v61  ;;  %v1336_v35 = vrot.slane %v1322_v30, %v3450_v61  ;;  %v1337_v36 = vcombine.low %v1305_v26, %v1320_v29  ;;  %v1338_v6 = vcombine.high %v1305_v26, %v1320_v29 }
 0x1f5   : > { %v1371_v37 = vrot.slane %v1357_v32, %v3443_v49  ;;  %v1372_v38 = vcombine.high %v825_v31, %v3113_v57  ;;  %v1379_v41 = vrot.slane %v825_v31, %v3443_v49  ;;  %v1530_v26 = vand.u32 127, %v436_v39 }
 0x1f6   : > { %v1345_v42 = vrot.slane %v1337_v36, %v3450_v61  ;;  %v1352_v5 = vrot.slane %v1338_v6, %v3450_v61  ;;  %v1423_v45 = vcombine.low %v1329_v34, %v1336_v35  ;;  %v2443_v11 = vcombine.high %v1329_v34, %v1336_v35 }
 0x1f7   : > { %v1386_v46 = vrot.slane %v1372_v38, %v3443_v49  ;;  %v1387_v47 = vcombine.low %v1364_v33, %v1379_v41  ;;  %v1388_v48 = vcombine.high %v1364_v33, %v1379_v41  ;;  %v1533_v28 = vsub.s32 %v3422_v40, %v1530_v26 }
 0x1f8   : > { %v1439_v50 = vcombine.low %v1345_v42, %v1352_v5  ;;  %v2444_v51 = vcombine.high %v1345_v42, %v1352_v5  ;;  %v1430_v2 = vrot.slane %v1423_v45, %v3443_v49  ;;  %v1438_v4 = vrot.slane %v2443_v11, %v3443_v49 }
 0x1f9   : > { %v1395_v53 = vrot.slane %v1387_v47, %v3450_v61  ;;  %v1402_v54 = vrot.slane %v1388_v48, %v3450_v61  ;;  %v1403_v56 = vcombine.low %v1371_v37, %v1386_v46  ;;  %v1404_v58 = vcombine.high %v1371_v37, %v1386_v46 }
 0x1fa   : > { %v1446_v7 = vrot.slane %v1439_v50, %v3443_v49  ;;  %v1454_v8 = vrot.slane %v2444_v51, %v3443_v49  ;;  %v1455_v12 = vcombine.low %v1430_v2, %v1438_v4  ;;  %v1534_v29 = vsub.s32 %v1525_v27, %v1530_v26 }
 0x1fb   : > { %v1411_v59 = vrot.slane %v1403_v56, %v3450_v61  ;;  %v1418_v60 = vrot.slane %v1404_v58, %v3450_v61  ;;  %v1473_v62 = vcombine.low %v1395_v53, %v1402_v54  ;;  %v2445_v63 = vcombine.high %v1395_v53, %v1402_v54 }
 0x1fc   : > { %v1463_v13 = vcombine.low %v1446_v7, %v1454_v8  ;;  %v1462_v16 = vrot.slane %v1455_v12, %v3450_v61  ;;  %vm1531_vm0 = vcmp.le.s32.totalorder %v1530_v26, %v3422_v40  ;;  %vm1535_vm1 = vcmp.le.s32.totalorder %v1533_v28, 5  ;;  %v2130_v7 = vld [vmem:[#allocation8] sm:$0xff]  ;;  %v2137_v12 = vld [vmem:[#allocation8 + $0x38] sm:$0xff]  ;;  %v2144_v28 = vld [vmem:[#allocation8 + $0x70] sm:$0xff] }
 0x1fd   : > { %v1489_v0 = vcombine.low %v1411_v59, %v1418_v60  ;;  %v2446_v1 = vcombine.high %v1411_v59, %v1418_v60  ;;  %v1480_v52 = vrot.slane %v1473_v62, %v3443_v49  ;;  %v1488_v55 = vrot.slane %v2445_v63, %v3443_v49  ;;  %vm1537_vm4 = vmand %vm1531_vm0, %vm1535_vm1 }
 0x1fe   : > { %v1470_v17 = vrot.slane %v1463_v13, %v3450_v61  ;;  %vm1532_vm2 = vcmp.le.s32.totalorder %v1530_v26, %v1525_v27  ;;  %vm1536_vm3 = vcmp.le.s32.totalorder %v1534_v29, 5  ;;  %v3114_v44 = vmov -1e+30   ;;  %v2142_v27 = vld [vmem:[#allocation8 + $0x60] sm:$0xff]  ;;  %v2147_v29 = vld [vmem:[#allocation8 + $0x88] sm:$0xff] }
 0x1ff   : > { %v1496_v9 = vrot.slane %v1489_v0, %v3443_v49  ;;  %v1504_v10 = vrot.slane %v2446_v1, %v3443_v49  ;;  %v1505_v14 = vcombine.low %v1480_v52, %v1488_v55  ;;  %vm1538_vm5 = vmand %vm1532_vm2, %vm1536_vm3  ;;  %v1539_v30 = vsel %vm1537_vm4, 0.0, %v3114_v44  ;;  %v2131_v52 = vld [vmem:[#allocation8 + $0x8] sm:$0xff]  ;;  %v2133_v55 = vld [vmem:[#allocation8 + $0x18] sm:$0xff] }
 0x200   : > { %v1471_v20 = vcombine.low %v1462_v16, %v1470_v17  ;;  %v1472_v22 = vcombine.high %v1462_v16, %v1470_v17  ;;  %v1540_v32 = vsel %vm1538_vm5, 0.0, %v3114_v44  ;;  %v2714_v8 = vpack.c.bf16 %v2133_v55, %v2131_v52  ;;  %v2136_v16 = vld [vmem:[#allocation8 + $0x30] sm:$0xff]  ;;  %v2139_v17 = vld [vmem:[#allocation8 + $0x48] sm:$0xff]  ;;  %v2149_v44 = vld [vmem:[#allocation8 + $0x98] sm:$0xff] }
 0x201   : > { %v1513_v15 = vcombine.low %v1496_v9, %v1504_v10  ;;  %v1512_v18 = vrot.slane %v1505_v14, %v3450_v61  ;;  %v2132_v9 = vld [vmem:[#allocation8 + $0x10] sm:$0xff]  ;;  %v2135_v10 = vld [vmem:[#allocation8 + $0x28] sm:$0xff] }
 0x202   : > { %v2716_v13 = vpack.c.bf16 %v2132_v9, %v2130_v7  ;;  %v2718_v14 = vpack.c.bf16 %v2137_v12, %v2135_v10  ;;  %v2171_v55 = vld [vmem:[#allocation8 + $0x148] sm:$0xff]  ;;  %v2173_v7 = vld [vmem:[#allocation8 + $0x158] sm:$0xff]  ;;  %v2170_v9 = vld [vmem:[#allocation8 + $0x140] sm:$0xff] }
 0x203   : > { %v1520_v19 = vrot.slane %v1513_v15, %v3450_v61  ;;  %v2134_v15 = vld [vmem:[#allocation8 + $0x20] sm:$0xff]  ;;  %v2172_v10 = vld [vmem:[#allocation8 + $0x150] sm:$0xff] }
 0x204   : > { %v2756_v12 = vpack.c.bf16 %v2172_v10, %v2170_v9 }
 0x205   : > { %v1521_v21 = vcombine.low %v1512_v18, %v1520_v19  ;;  %v1522_v23 = vcombine.high %v1512_v18, %v1520_v19  ;;  %v2141_v18 = vld [vmem:[#allocation8 + $0x58] sm:$0xff]  ;;  %v2720_v19 = vpack.c.bf16 %v2136_v16, %v2134_v15  ;;  %v2174_v16 = vld [vmem:[#allocation8 + $0x160] sm:$0xff] }
 0x207   : > { %v2706_v24 = vpack.c.bf16 %v1521_v21, %v1471_v20  ;;  %v2710_v25 = vpack.c.bf16 %v1522_v23, %v1472_v22  ;;  %v2722_v20 = vpack.c.bf16 %v2141_v18, %v2139_v17  ;;  %v2138_v21 = vld [vmem:[#allocation8 + $0x40] sm:$0xff]  ;;  %v2140_v22 = vld [vmem:[#allocation8 + $0x50] sm:$0xff]  ;;  %v2143_v23 = vld [vmem:[#allocation8 + $0x68] sm:$0xff] }
 0x208   : > { %v2176_v17 = vld [vmem:[#allocation8 + $0x170] sm:$0xff] }
 0x209   : > { %2707 = vmatprep.subr.bf16.mxu1 %v2706_v24  ;;  %v2760_v18 = vpack.c.bf16 %v2176_v17, %v2174_v16 }
 0x20a   : > { %2709 = vmatpush3.bf16.msra.mxu1 %v2706_v24  ;;  %v2145_v24 = vld [vmem:[#allocation8 + $0x78] sm:$0xff] }
 0x20b   : > { %2711 = vmatprep.subr.bf16.mxu1 %v2710_v25  ;;  %v2726_v26 = vpack.c.bf16 %v2145_v24, %v2143_v23  ;;  %v2180_v23 = vld [vmem:[#allocation8 + $0x190] sm:$0xff] }
 0x2a5   : > { %v2484_v31 = vpop.f32.mrb[8].mxu0 }
 0x2a6   : > { %v1607_v33 = vpop.f32.mrb[9].mxu0  ;;  %v1613_v39 = vadd.f32 %v2484_v31, %v1540_v32  ;;  %v2730_v31 = vpack.c.bf16 %v2149_v44, %v2147_v29  ;;  %v2184_v29 = vld [vmem:[#allocation8 + $0x1b0] sm:$0xff]  ;;  %v2187_v44 = vld [vmem:[#allocation8 + $0x1c8] sm:$0xff] }
 0x2a7   : > { %v1608_v34 = vadd.f32 %v1607_v33, %v1539_v30  ;;  %v2148_v33 = vld [vmem:[#allocation8 + $0x90] sm:$0xff] }
 0x2a8   : > { %v1695_v6 = vsel %vm1691_vm6, %v1613_v39, -inf }
 0x2a9   : > { %v1692_v35 = vsel %vm1691_vm6, %v1608_v34, -inf }
 0x2aa   : > { %1693 = vmax.xlane.f32.xlu0 %v1692_v35 }
 0x2ad   : > { %v2491_v36 = vpop.f32.mrb[10].mxu0 }
 0x2ae   : > { %v1682_v40 = vpop.f32.mrb[11].mxu0  ;;  %1696 = vmax.xlane.f32.xlu0 %v1695_v6  ;;  %v1688_v38 = vadd.f32 %v2491_v36, %v1540_v32  ;;  %v2146_v32 = vld [vmem:[#allocation8 + $0x80] sm:$0xff] }
 0x2af   : > { %v1683_v37 = vadd.f32 %v1682_v40, %v1539_v30  ;;  %v2728_v30 = vpack.c.bf16 %v2144_v28, %v2142_v27  ;;  %v2732_v35 = vpack.c.bf16 %v2148_v33, %v2146_v32  ;;  %v2150_v6 = vld [vmem:[#allocation8 + $0xa0] sm:$0xff]  ;;  %v2152_v40 = vld [vmem:[#allocation8 + $0xb0] sm:$0xff] }
 0x2b0   : > { %v1701_v42 = vsel %vm1691_vm6, %v1688_v38, -inf  ;;  %v2182_v27 = vld [vmem:[#allocation8 + $0x1a0] sm:$0xff] }
 0x2b1   : > { %v1698_v41 = vsel %vm1691_vm6, %v1683_v37, -inf  ;;  %v2186_v33 = vld [vmem:[#allocation8 + $0x1c0] sm:$0xff] }
 0x2b2   : > { %1699 = vmax.xlane.f32.xlu1 %v1698_v41  ;;  %v2736_v41 = vpack.c.bf16 %v2152_v40, %v2150_v6  ;;  %v2190_v40 = vld [vmem:[#allocation8 + $0x1e0] sm:$0xff] }
 0x2b6   : > { %1702 = vmax.xlane.f32.xlu1 %v1701_v42 }
 0x337   : > { %v1694_v5 = vpop.xlane.xlu0 %1693 }
 0x338   : > { %v1704_v45 = vsub.f32 %v1608_v34, %v1694_v5  ;;  %v2151_v34 = vld [vmem:[#allocation8 + $0xa8] sm:$0xff]  ;;  %v2154_v5 = vld [vmem:[#allocation8 + $0xc0] sm:$0xff] }
 0x33a   : > { %v1708_v11 = vmul.f32 1.442695, %v1704_v45  ;;  %v2156_v45 = vld [vmem:[#allocation8 + $0xd0] sm:$0xff] }
 0x33b   : > { %v1697_v46 = vpop.xlane.xlu0 %1696 }
 0x33c   : > { %2881 = vpow2.f32 %v1708_v11  ;;  %v1705_v47 = vsub.f32 %v1613_v39, %v1697_v46  ;;  %v2153_v39 = vld [vmem:[#allocation8 + $0xb8] sm:$0xff]  ;;  %v2159_v11 = vld [vmem:[#allocation8 + $0xe8] sm:$0xff] }
 0x33d   : > { %v2734_v36 = vpack.c.bf16 %v2153_v39, %v2151_v34  ;;  %v2161_v46 = vld [vmem:[#allocation8 + $0xf8] sm:$0xff]  ;;  %v2188_v34 = vld [vmem:[#allocation8 + $0x1d0] sm:$0xff]  ;;  %v2191_v39 = vld [vmem:[#allocation8 + $0x1e8] sm:$0xff] }
 0x33e   : > { %v1710_v48 = vmul.f32 1.442695, %v1705_v47  ;;  %v2740_v47 = vpack.c.bf16 %v2156_v45, %v2154_v5 }
 0x33f   : > { %v1700_v50 = vpop.xlane.xlu1 %1699 }
 0x340   : > { %2883 = vpow2.f32 %v1710_v48  ;;  %v1706_v51 = vsub.f32 %v1683_v37, %v1700_v50  ;;  %v2155_v37 = vld [vmem:[#allocation8 + $0xc8] sm:$0xff]  ;;  %v2742_v48 = vpack.c.bf16 %v2161_v46, %v2159_v11  ;;  %v2158_v50 = vld [vmem:[#allocation8 + $0xe0] sm:$0xff] }
 0x342   : > { %v1712_v53 = vmul.f32 1.442695, %v1706_v51  ;;  %v2160_v51 = vld [vmem:[#allocation8 + $0xf0] sm:$0xff] }
 0x343   : > { %v1703_v54 = vpop.xlane.xlu1 %1702 }
 0x344   : > { %2885 = vpow2.f32 %v1712_v53  ;;  %v1707_v56 = vsub.f32 %v1688_v38, %v1703_v54  ;;  %v2157_v38 = vld [vmem:[#allocation8 + $0xd8] sm:$0xff]  ;;  %v2163_v53 = vld [vmem:[#allocation8 + $0x108] sm:$0xff] }
 0x345   : > { %v2738_v42 = vpack.c.bf16 %v2157_v38, %v2155_v37  ;;  %v2165_v54 = vld [vmem:[#allocation8 + $0x118] sm:$0xff]  ;;  %v2192_v37 = vld [vmem:[#allocation8 + $0x1f0] sm:$0xff] }
 0x346   : > { %v2882_v58 = vpop.eup %2881  ;;  %v1714_v59 = vmul.f32 1.442695, %v1707_v56  ;;  %v2744_v56 = vpack.c.bf16 %v2160_v51, %v2158_v50  ;;  %v2776_v38 = vpack.c.bf16 %v2192_v37, %v2190_v40 }
 0x347   : > { %2496 = vmatprep.mubr.msk.f32.mxu1 %vm1691_vm6, %v2882_v58  ;;  %v1716_v60 = vsel %vm1691_vm6, %v2882_v58, 0.0  ;;  %v2746_v58 = vpack.c.bf16 %v2165_v54, %v2163_v53 }
 0x348   : > { %2887 = vpow2.f32 %v1714_v59  ;;  %1717 = vadd.xlane.f32.xlu0 %v1716_v60  ;;  %v2162_v59 = vld [vmem:[#allocation8 + $0x100] sm:$0xff]  ;;  %v2164_v60 = vld [vmem:[#allocation8 + $0x110] sm:$0xff] }
 0x34a   : > { %v2884_v62 = vpop.eup %2883 }
 0x34b   : > { %2497 = vmatmul.mubr.msk.f32.vlgmr.msra.gmra.mrb[4].mxu1 %vm1691_vm6, %v2884_v62  ;;  %v1719_v63 = vsel %vm1691_vm6, %v2884_v62, 0.0  ;;  %v2748_v62 = vpack.c.bf16 %v2164_v60, %v2162_v59 }
 0x34c   : > { %2713 = vmatpush3.bf16.msra.mxu1 %v2710_v25  ;;  %1720 = vadd.xlane.f32.xlu0 %v1719_v63  ;;  %v2724_v25 = vpack.c.bf16 %v2140_v22, %v2138_v21  ;;  %v2167_v63 = vld [vmem:[#allocation8 + $0x128] sm:$0xff]  ;;  %v2178_v22 = vld [vmem:[#allocation8 + $0x180] sm:$0xff] }
 0x34d   : > { %2715 = vmatprep.subr.bf16.mxu1 %v2714_v8  ;;  %v2754_v8 = vpack.c.bf16 %v2173_v7, %v2171_v55  ;;  %v2764_v24 = vpack.c.bf16 %v2180_v23, %v2178_v22 }
 0x34e   : > { %v2886_v0 = vpop.eup %2885 }
 0x34f   : > { %2503 = vmatprep.mubr.msk.f32.mxu1 %vm1691_vm6, %v2886_v0  ;;  %v1722_v1 = vsel %vm1691_vm6, %v2886_v0, 0.0  ;;  %v2169_v0 = vld [vmem:[#allocation8 + $0x138] sm:$0xff] }
 0x350   : > { %1723 = vadd.xlane.f32.xlu1 %v1722_v1  ;;  %v2750_v1 = vpack.c.bf16 %v2169_v0, %v2167_v63 }
 0x352   : > { %v2888_v2 = vpop.eup %2887 }
 0x353   : > { %2504 = vmatmul.mubr.msk.f32.vlgmr.msra.gmra.mrb[6].mxu1 %vm1691_vm6, %v2888_v2  ;;  %v1725_v4 = vsel %vm1691_vm6, %v2888_v2, 0.0  ;;  %v2166_v2 = vld [vmem:[#allocation8 + $0x120] sm:$0xff] }
 0x354   : > { %1726 = vadd.xlane.f32.xlu1 %v1725_v4  ;;  %2717 = vmatpush1.bf16.msra.mxu1 %v2716_v13  ;;  %v2168_v4 = vld [vmem:[#allocation8 + $0x130] sm:$0xff]  ;;  %v2175_v13 = vld [vmem:[#allocation8 + $0x168] sm:$0xff] }
 0x355   : > { %2719 = vmatprep.subr.bf16.mxu1 %v2718_v14  ;;  %v2752_v52 = vpack.c.bf16 %v2168_v4, %v2166_v2  ;;  %v2177_v14 = vld [vmem:[#allocation8 + $0x178] sm:$0xff] }
 0x356   : > { %v2758_v15 = vpack.c.bf16 %v2177_v14, %v2175_v13 }
 0x358   : > { %2721 = vmatpush1.bf16.msra.mxu1 %v2720_v19  ;;  %v2179_v19 = vld [vmem:[#allocation8 + $0x188] sm:$0xff] }
 0x359   : > { %2723 = vmatprep.subr.bf16.mxu1 %v2722_v20  ;;  %v2181_v20 = vld [vmem:[#allocation8 + $0x198] sm:$0xff] }
 0x35a   : > { %v2762_v21 = vpack.c.bf16 %v2181_v20, %v2179_v19 }
 0x35c   : > { %2725 = vmatpush1.bf16.msra.mxu1 %v2724_v25  ;;  %v2183_v25 = vld [vmem:[#allocation8 + $0x1a8] sm:$0xff] }
 0x35d   : > { %2727 = vmatprep.subr.bf16.mxu1 %v2726_v26  ;;  %v2185_v26 = vld [vmem:[#allocation8 + $0x1b8] sm:$0xff] }
 0x35e   : > { %v2766_v28 = vpack.c.bf16 %v2185_v26, %v2183_v25 }
 0x360   : > { %2729 = vmatpush1.bf16.msra.mxu1 %v2728_v30  ;;  %v2189_v30 = vld [vmem:[#allocation8 + $0x1d8] sm:$0xff] }
 0x361   : > { %2731 = vmatprep.subr.bf16.mxu1 %v2730_v31  ;;  %v2768_v31 = vpack.c.bf16 %v2184_v29, %v2182_v27  ;;  %v2770_v32 = vpack.c.bf16 %v2189_v30, %v2187_v44 }
 0x364   : > { %2733 = vmatpush1.bf16.msra.mxu1 %v2732_v35  ;;  %v2193_v35 = vld [vmem:[#allocation8 + $0x1f8] sm:$0xff] }
 0x365   : > { %2735 = vmatprep.subr.bf16.mxu1 %v2734_v36  ;;  %v2772_v36 = vpack.c.bf16 %v2188_v34, %v2186_v33  ;;  %v2774_v6 = vpack.c.bf16 %v2193_v35, %v2191_v39 }
 0x368   : > { %2737 = vmatpush1.bf16.msra.mxu1 %v2736_v41 }
 0x369   : > { %2739 = vmatprep.subr.bf16.mxu1 %v2738_v42 }
 0x36c   : > { %2741 = vmatpush1.bf16.msra.mxu1 %v2740_v47 }
 0x36d   : > { %2743 = vmatprep.subr.bf16.mxu1 %v2742_v48 }
 0x370   : > { %2745 = vmatpush1.bf16.msra.mxu1 %v2744_v56 }
 0x371   : > { %2747 = vmatprep.subr.bf16.mxu1 %v2746_v58 }
 0x374   : > { %2749 = vmatpush1.bf16.msra.mxu1 %v2748_v62 }
 0x375   : > { %2751 = vmatprep.subr.bf16.mxu1 %v2750_v1 }
 0x378   : > { %2753 = vmatpush1.bf16.msra.mxu1 %v2752_v52 }
 0x379   : > { %2755 = vmatprep.subr.bf16.mxu1 %v2754_v8 }
 0x37c   : > { %2757 = vmatpush1.bf16.msra.mxu1 %v2756_v12 }
 0x37d   : > { %2759 = vmatprep.subr.bf16.mxu1 %v2758_v15 }
 0x380   : > { %2761 = vmatpush1.bf16.msra.mxu1 %v2760_v18 }
 0x381   : > { %2763 = vmatprep.subr.bf16.mxu1 %v2762_v21 }
 0x384   : > { %2765 = vmatpush1.bf16.msra.mxu1 %v2764_v24 }
 0x385   : > { %2767 = vmatprep.subr.bf16.mxu1 %v2766_v28 }
 0x388   : > { %2769 = vmatpush1.bf16.msra.mxu1 %v2768_v31 }
 0x389   : > { %2771 = vmatprep.subr.bf16.mxu1 %v2770_v32 }
 0x38c   : > { %2773 = vmatpush1.bf16.msra.mxu1 %v2772_v36 }
 0x38d   : > { %2775 = vmatprep.subr.bf16.mxu1 %v2774_v6 }
 0x390   : > { %2777 = vmatpush1.bf16.msra.mxu1 %v2776_v38 }
 0x3d5   : > { %v1718_v41 = vpop.xlane.xlu0 %1717 }
 0x3d9   : > { %v1721_v5 = vpop.xlane.xlu0 %1720 }
 0x3da   : > { %2889 = vrcp.f32 %v1721_v5 }
 0x3db   : > { %2891 = vrcp.f32 %v1718_v41 }
 0x3dd   : > { %v1724_v42 = vpop.xlane.xlu1 %1723 }
 0x3e1   : > { %v1727_v45 = vpop.xlane.xlu1 %1726 }
 0x3e2   : > { %2893 = vrcp.f32 %v1727_v45 }
 0x3e3   : > { %2895 = vrcp.f32 %v1724_v42 }
 0x3e4   : > { %v2890_v47 = vpop.eup %2889 }
 0x3e5   : > { %v2892_v48 = vpop.eup %2891 }
 0x3ec   : > { %v2894_v53 = vpop.eup %2893 }
 0x3ed   : > { %v2896_v56 = vpop.eup %2895 }
 0x41e   : > { %v2498_v11 = vpop.f32.mrb[4].mxu1 }
 0x41f   : > { %v1800_v46 = vpop.f32.mrb[5].mxu1  ;;  %v1895_v50 = vmul.f32 %v2890_v47, %v2498_v11 }
 0x420   : > { %v1894_v51 = vmul.f32 %v2892_v48, %v1800_v46 }
 0x421   : > { %v1964_v58 = vcombine.high %v1895_v50, %v3113_v57  ;;  %v1971_v0 = vrot.slane %v1895_v50, %v3443_v49 }
 0x422   : > { %v1898_v62 = vcombine.high %v1894_v51, %v3113_v57  ;;  %v1905_v4 = vrot.slane %v1894_v51, %v3443_v49 }
 0x423   : > { %v1978_v7 = vrot.slane %v1964_v58, %v3443_v49 }
 0x424   : > { %v1912_v12 = vrot.slane %v1898_v62, %v3443_v49 }
 0x426   : > { %v2505_v54 = vpop.f32.mrb[6].mxu1 }
 0x427   : > { %v1897_v59 = vmul.f32 %v2894_v53, %v2505_v54  ;;  %v1881_v60 = vpop.f32.mrb[7].mxu1 }
 0x428   : > { %v1896_v63 = vmul.f32 %v2896_v56, %v1881_v60 }
 0x429   : > { %v1979_v1 = vcombine.high %v1897_v59, %v3113_v57  ;;  %v1986_v2 = vrot.slane %v1897_v59, %v3443_v49 }
 0x42a   : > { %v1913_v52 = vcombine.high %v1896_v63, %v3113_v57  ;;  %v1920_v55 = vrot.slane %v1896_v63, %v3443_v49 }
 0x42b   : > { %v1993_v8 = vrot.slane %v1979_v1, %v3443_v49  ;;  %v1994_v9 = vcombine.low %v1971_v0, %v1986_v2  ;;  %v1995_v10 = vcombine.high %v1971_v0, %v1986_v2 }
 0x42c   : > { %v1927_v13 = vrot.slane %v1913_v52, %v3443_v49  ;;  %v1928_v14 = vcombine.low %v1905_v4, %v1920_v55  ;;  %v1929_v15 = vcombine.high %v1905_v4, %v1920_v55 }
 0x42d   : > { %v2002_v16 = vrot.slane %v1994_v9, %v3450_v61  ;;  %v2009_v17 = vrot.slane %v1995_v10, %v3450_v61  ;;  %v2010_v18 = vcombine.low %v1978_v7, %v1993_v8  ;;  %v2011_v57 = vcombine.high %v1978_v7, %v1993_v8 }
 0x42e   : > { %v1936_v19 = vrot.slane %v1928_v14, %v3450_v61  ;;  %v1943_v20 = vrot.slane %v1929_v15, %v3450_v61  ;;  %v1944_v21 = vcombine.low %v1912_v12, %v1927_v13  ;;  %v1945_v22 = vcombine.high %v1912_v12, %v1927_v13 }
 0x42f   : > { %v2018_v23 = vrot.slane %v2010_v18, %v3450_v61  ;;  %v2025_v24 = vrot.slane %v2011_v57, %v3450_v61  ;;  %v2080_v25 = vcombine.low %v2002_v16, %v2009_v17  ;;  %v2453_v26 = vcombine.high %v2002_v16, %v2009_v17 }
 0x430   : > { %v1952_v27 = vrot.slane %v1944_v21, %v3450_v61  ;;  %v1959_v28 = vrot.slane %v1945_v22, %v3450_v61  ;;  %v2030_v29 = vcombine.low %v1936_v19, %v1943_v20  ;;  %v2451_v44 = vcombine.high %v1936_v19, %v1943_v20 }
 0x431   : > { %v2096_v30 = vcombine.low %v2018_v23, %v2025_v24  ;;  %v2454_v31 = vcombine.high %v2018_v23, %v2025_v24  ;;  %v2087_v32 = vrot.slane %v2080_v25, %v3443_v49  ;;  %v2095_v33 = vrot.slane %v2453_v26, %v3443_v49 }
 0x432   : > { %v2046_v34 = vcombine.low %v1952_v27, %v1959_v28  ;;  %v2452_v39 = vcombine.high %v1952_v27, %v1959_v28  ;;  %v2037_v35 = vrot.slane %v2030_v29, %v3443_v49  ;;  %v2045_v36 = vrot.slane %v2451_v44, %v3443_v49 }
 0x433   : > { %v2103_v6 = vrot.slane %v2096_v30, %v3443_v49  ;;  %v2111_v40 = vrot.slane %v2454_v31, %v3443_v49  ;;  %v2112_v37 = vcombine.low %v2087_v32, %v2095_v33 }
 0x434   : > { %v2053_v38 = vrot.slane %v2046_v34, %v3443_v49  ;;  %v2061_v41 = vrot.slane %v2452_v39, %v3443_v49  ;;  %v2062_v42 = vcombine.low %v2037_v35, %v2045_v36  ;;  %v2194_v49 = vld [vmem:[%s3666_s6] sm:$0x3] }
 0x435   : > { %v2120_v5 = vcombine.low %v2103_v6, %v2111_v40  ;;  %v2119_v11 = vrot.slane %v2112_v37, %v3450_v61  ;;  %v2199_v56 = vrot.slane %v2194_v49, %v3425_v43  ;;  %v2203_v58 = vrot.slane %v2194_v49, %v3433_v3 }
 0x436   : > { %v2070_v45 = vcombine.low %v2053_v38, %v2061_v41  ;;  %v2069_v47 = vrot.slane %v2062_v42, %v3450_v61 }
 0x437   : > { %v2127_v46 = vrot.slane %v2120_v5, %v3450_v61 }
 0x438   : > { %v2077_v48 = vrot.slane %v2070_v45, %v3450_v61 }
 0x439   : > { %v2129_v50 = vcombine.high %v2119_v11, %v2127_v46  ;;  %v2128_v51 = vcombine.low %v2119_v11, %v2127_v46 }
 0x43a   : > { %v2079_v53 = vcombine.high %v2069_v47, %v2077_v48  ;;  %v2078_v54 = vcombine.low %v2069_v47, %v2077_v48 }
 0x43c   : > { %2270 = vmatprep.mubr.f32.mxu1 %v2079_v53 }
 0x43d   : > { %2271 = vmatmul.mubr.f32.vlgmr.msra.gmra.mrb[8].mxu1 %v2078_v54 }
 0x43e   : > { %2276 = vmatprep.mubr.f32.mxu1 %v2129_v50 }
 0x441   : > { %2277 = vmatmul.mubr.f32.gmra.mrb[10].mxu1 %v2128_v51 }
 0x510   : > { %v2272_v59 = vpop.f32.mrb[8].mxu1 }
 0x511   : > { %v2273_v60 = vadd.f32 %v2272_v59, %v2199_v56  ;;  %v2274_v61 = vpop.f32.mrb[9].mxu1 }
 0x512   : > { %v2275_v62 = vadd.f32 %v2274_v61, %v2203_v58 }
 0x513   : > { %2283 = vst [vmem:[%s354_s1] sm:$0xff] %v2273_v60 }
 0x514   : > { %2284 = vst [vmem:[%s354_s1 + $0x8] sm:$0xff] %v2275_v62  ;;  %v2278_v63 = vpop.f32.mrb[10].mxu1 }
 0x515   : > { %v2279_v43 = vadd.f32 %v2278_v63, %v2199_v56  ;;  %v2280_v3 = vpop.f32.mrb[11].mxu1 }
 0x516   : > { %v2281_v0 = vadd.f32 %v2280_v3, %v2203_v58 }
 0x517   : > { %2285 = vst [vmem:[%s354_s1 + $0x10] sm:$0xff] %v2279_v43 }
 0x518   : > { %2286 = vst [vmem:[%s354_s1 + $0x18] sm:$0xff] %v2281_v0 }
 0x519   : > { %3024 = shalt.err (!%p3021_p0)
}
 0x51a   : > { %s3025_s11 = scalar_lea.hbm %s3611_s14, 512  ;;  %s3029_s12 = scalar_lea.hbm %s3700_s23, 1024 }
 0x51b   : > { %p3026_p4 = scmp.ne.s32.totalorder %s3611_s14, %s3025_s11  ;;  %p3030_p12 = scmp.lt.u32.totalorder %s3611_s14, %s3700_s23 }
 0x51c   : > { %p3031_p1 = scmp.lt.u32.totalorder %s3029_s12, %s3025_s11  ;;  %p3033_p13 = scmp.lt.u32.totalorder %s3025_s11, %s3611_s14 }
 0x51d   : > { %p3027_p2 = pnand %p3026_p4, %p3318_p3 }
 0x51e   : > { %p3032_p7 = por %p3031_p1, %p3030_p12 }
 0x51f   : > { %p3028_p8 = pneg %p3027_p2 }
 0x520   : > { %p3034_p6 = por %p3033_p13, %p3032_p7 }
 0x522   : > { %p3035_p10 = pnand %p3034_p6, %p3028_p8 }
 0x524   : > { %3038 = shalt.err (!%p3035_p10)
}
 0x525   : > { %s3116_s15 = smov 256   ;;  %s3117_s22 = smov 16  }
 0x526   : > { %2792 = dma.vmem_to_hbm [thread:$0]  (%p3318_p3), %s3606_s16, 512, %s3611_s14, %s2288_s7, %s3116_s15, %s3116_s15, %s3117_s22  }
 0x527 PF: > { %s3701_s10 = sld [smem:[#allocation15_spill]]  ;;  %s3702_s27 = sld [smem:[#allocation16_spill]] }
 0x528   : > { %p3704_p5 = scmp.ge.s32.totalorder %s3101_s29, 2 }
 0x52d   : > { %s2319_s17 = sand.u32 1, %s3701_s10   ;;  %p3703_p11 = scmp.ne.s32.totalorder %s3702_s27, 0 }
 0x52e   : > { %s2320_s20 = scalar_lea.sflag [#allocation4], %s2319_s17 }
 0x52f   : > { %p2809_p9 = pnand %p3704_p5, %p3703_p11 }
 0x531   : > { %3076 = dma.done.wait (!%p2809_p9), %s2320_s20, 512  }
 0x532   : > { %3078 = vsyncadd (!%p2809_p9), %s2320_s20, 4294966784  ;;  %s25_s29 = sadd.s32 1, %s3101_s29   ;;  %s3705_s24 = smov %s3085_s25 }
 0x533   : > { %p22_p0 = scmp.ge.s32.totalorder %s25_s29, 4   ;;  %s3706_s25 = smov %s3089_s26 }
 0x534   : > { %s3707_s26 = smov %s3327_s8  ;;  %s3708_s27 = smov %s3097_s28 }
 0x535   : > { %s3709_s28 = smov %s3711_s30  ;;  %24 = sbr.rel (!%p22_p0) target bundleno = 11 (0xb), region = 106 }
 0x53c   :  { %2325 = vsyncpa [#allocation3], 1 }
 0x53d   :  { %2327 = vsyncpa [#allocation3 + $0x1], 1 }
 0x53e   :  { %2328 = vsyncpa [#allocation6], 1 }
 0x53f   :  { %2329 = vsyncpa [#allocation9], 1 }
 0x540   :  { %2330 = vsyncpa [#allocation4], 1 }
 0x541   :  { %2332 = vsyncpa [#allocation4 + $0x1], 1 }

</bundles_post_ra>
